<compile_context>
chip_gen: v7x
topology: tpu7x:2x2x1
jax: 0.10.0
libtpu: 0.0.40
codegen_flags: <defaults>
</compile_context>

<pallas_src>
import numpy as np
import jax
import jax.numpy as jnp
from jax import lax
from jax.experimental import pallas as pl
from jax.experimental.pallas import tpu as pltpu


# ----------------------------------------------------------------------------
# Pallas kernel: processes BB batch elements per grid step.
# ----------------------------------------------------------------------------
def _pointnet_kernel(
    p_ref,                                   # (BB, N, D) f32
    wpos_ref, bpos_ref,                      # (D, 2H) f32, (1, 2H) f32
    w0f0_ref, b0f0_ref,                      # (2H, H) bf16, (1, H) f32
    w0f1_ref, b0f1_ref,                      # (H, H) bf16,  (1, H) f32
    w0sc_ref,                                # (2H, H) bf16
    wa_ref, wbs_ref, bf0_ref,                # (4,H,H) bf16, (4,H,2H) bf16, (4,1,H) f32
    wf1_ref, bf1_ref,                        # (4,H,H) bf16, (4,1,H) f32
    sa_ref,                                  # (4,H,H) bf16
    wc_ref, bc_ref,                          # (H, C) bf16,  (1, C) f32
    c_ref, netf_ref,                         # outs: (BB,1,C), (BB,N,H)
):
    f32 = jnp.float32
    cdt = jnp.bfloat16                       # MXU-native operand dtype
    BB, N, D = p_ref.shape
    H = w0f1_ref.shape[0]

    def mm(x3, w):
        """(BB, N, K) f32  @  (K, Kout) bf16  ->  (BB, N, Kout) f32 (f32 accum)."""
        x2 = x3.reshape(BB * N, x3.shape[-1]).astype(cdt)
        y2 = jnp.dot(x2, w, preferred_element_type=f32)
        return y2.reshape(BB, N, w.shape[-1])

    # ---- fc_pos: K = D (=3) is too small for the MXU -> D rank-1 VPU FMAs ----
    x2 = p_ref[...].reshape(BB * N, D).astype(f32)
    net2 = x2[:, 0:1] * wpos_ref[0:1, :] + bpos_ref[...]               # (BB*N, 2H)
    for d in range(1, D):                                              # D is tiny & static
        net2 = net2 + x2[:, d:d + 1] * wpos_ref[d:d + 1, :]
    net = net2.reshape(BB, N, 2 * H)

    # ---- block_0: 2H -> H ----------------------------------------------------
    rx = jnp.maximum(net, 0.0)
    h = mm(rx, w0f0_ref[...]) + b0f0_ref[...]
    dx = mm(jnp.maximum(h, 0.0), w0f1_ref[...]) + b0f1_ref[...]
    net = mm(net, w0sc_ref[...]) + dx                                  # (BB, N, H)

    # ---- blocks 1..4: pool over points, "concat" realized as split weights ---
    def block_body(i, net):
        pooled = jnp.max(net, axis=1)                                  # (BB, H)
        # One merged MXU push computes both pooled contributions:
        #   rows [:BB]  @ wbs[:, :H]  == relu(pooled) @ wb   (fc_0 half)
        #   rows [BB:]  @ wbs[:, H:]  == pooled       @ sb   (shortcut half)
        plhs = jnp.concatenate([jnp.maximum(pooled, 0.0), pooled], axis=0)
        pres = jnp.dot(plhs.astype(cdt), wbs_ref[i],
                       preferred_element_type=f32)                     # (2BB, 2H)
        pb = pres[:BB, :H].reshape(BB, 1, H)
        ps = pres[BB:, H:].reshape(BB, 1, H)

        rn = jnp.maximum(net, 0.0)
        h = mm(rn, wa_ref[i]) + pb + bf0_ref[i]
        dx = mm(jnp.maximum(h, 0.0), wf1_ref[i]) + bf1_ref[i]
        xs = mm(net, sa_ref[i]) + ps
        return xs + dx                                                 # (BB, N, H)

    net = lax.fori_loop(0, 4, block_body, net, unroll=True)

    netf_ref[...] = net.astype(netf_ref.dtype)                         # net_F

    pooled = jnp.max(net, axis=1)                                      # (BB, H)
    c = jnp.dot(jnp.maximum(pooled, 0.0).astype(cdt), wc_ref[...],
                preferred_element_type=f32) + bc_ref[...]              # (BB, C)
    c_ref[...] = c.reshape(BB, 1, -1).astype(c_ref.dtype)


# ----------------------------------------------------------------------------
# Wrapper
# ----------------------------------------------------------------------------
def _choose_block_batch(B, N):
    """Pick BB (divisor of B) so each grid step processes ~<=1024 points but the
    MXU M dimension is reasonably filled; keep >=2 grid steps when that still
    gives >=128 rows (so both v7x TensorCores can be used)."""
    bb = 1
    for d in range(1, B + 1):
        if B % d == 0 and d * N <= 1024:
            bb = d
    if bb == B and B >= 2:
        half = B // 2
        if half >= 1 and B % half == 0 and half * N >= 128:
            bb = half
    return bb


def resnet_pointnet_forward(p, params, block_batch=None):
    B, N, D = p.shape
    H = params["w0f1_t"].shape[0]
    C = params["wc_t"].shape[1]
    BB = block_batch if block_batch is not None else _choose_block_batch(B, N)
    assert B % BB == 0

    bf16, f32 = jnp.bfloat16, jnp.float32
    # Matmul weights -> bf16 (MXU operands); biases and the rank-1 fc_pos weight
    # stay f32 (VPU adds).  wb/sb are merged into one (H, 2H) pooled weight.
    weights = [
        params["wpos_t"].astype(f32),                                   # (D, 2H)
        params["bpos"].astype(f32).reshape(1, 2 * H),
        params["w0f0_t"].astype(bf16),                                  # (2H, H)
        params["b0f0"].astype(f32).reshape(1, H),
        params["w0f1_t"].astype(bf16),                                  # (H, H)
        params["b0f1"].astype(f32).reshape(1, H),
        params["w0sc_t"].astype(bf16),                                  # (2H, H)
        params["wa_t"].astype(bf16),                                    # (4, H, H)
        jnp.concatenate([params["wb_t"], params["sb_t"]], axis=-1).astype(bf16),  # (4, H, 2H)
        params["bf0"].astype(f32).reshape(4, 1, H),
        params["wf1_t"].astype(bf16),                                   # (4, H, H)
        params["bf1"].astype(f32).reshape(4, 1, H),
        params["sa_t"].astype(bf16),                                    # (4, H, H)
        params["wc_t"].astype(bf16),                                    # (H, C)
        params["bc"].astype(f32).reshape(1, C),
    ]

    def full_spec(arr):
        # Grid-invariant weight block (index map constant across the grid).
        return pl.BlockSpec(arr.shape, lambda b, n=arr.ndim: (0,) * n)

    in_specs = [pl.BlockSpec((BB, N, D), lambda b: (b, 0, 0))]
    in_specs += [full_spec(w) for w in weights]

    out_specs = [
        pl.BlockSpec((BB, 1, C), lambda b: (b, 0, 0)),
        pl.BlockSpec((BB, N, H), lambda b: (b, 0, 0)),
    ]
    out_shapes = (
        jax.ShapeDtypeStruct((B, 1, C), jnp.float32),
        jax.ShapeDtypeStruct((B, N, H), jnp.float32),
    )

    # Explicit VMEM budget: weights (x2 headroom) + double-buffered p/c/net_F
    # blocks + the largest live (BB, N, 2H) f32 temporaries.  Clamped to a range
    # that is safe on v5e (16 MiB scoped default), v6e and v7x (64 MiB physical).
    wbytes = sum(int(w.size) * w.dtype.itemsize for w in weights)
    io_bytes = 2 * 4 * (BB * N * D + BB * C + BB * N * H)
    tmp_bytes = 8 * 4 * BB * N * 2 * H
    vmem_limit = int(min(48 * 2**20,
                         max(32 * 2**20, 1.3 * (2 * wbytes + io_bytes + tmp_bytes))))

    c3, net_f = pl.pallas_call(
        _pointnet_kernel,
        out_shape=out_shapes,
        grid_spec=pltpu.PrefetchScalarGridSpec(
            num_scalar_prefetch=0,
            grid=(B // BB,),
            in_specs=in_specs,
            out_specs=out_specs,
        ),
        compiler_params=pltpu.CompilerParams(
            dimension_semantics=("parallel",),
            vmem_limit_bytes=vmem_limit,
        ),
    )(p, *weights)

    c = c3.reshape(B, C)
    # Match the PyTorch return signature: (c, [net_F], None, None)
    return c, [net_f], None, None


# ----------------------------------------------------------------------------
# Deterministic parameter construction (shapes from ResnetPointnet.__init__)
# ----------------------------------------------------------------------------
def init_params(key, dim=3, hidden_dim=128, c_dim=128):
    H, D, C = hidden_dim, dim, c_dim
    ks = iter(jax.random.split(key, 64))

    def w(shape, scale=0.1):
        return (scale * jax.random.normal(next(ks), shape)).astype(jnp.float32)

    params = {
        # fc_pos: Linear(D, 2H) -> stored transposed (D, 2H)
        "wpos_t": w((D, 2 * H)),
        "bpos":   w((1, 2 * H)),
        # block_0: fc_0 Linear(2H, H), fc_1 Linear(H, H), shortcut Linear(2H, H, bias=False)
        "w0f0_t": w((2 * H, H)),
        "b0f0":   w((1, H)),
        "w0f1_t": w((H, H)),
        "b0f1":   w((1, H)),
        "w0sc_t": w((2 * H, H)),
        # blocks 1..4 (stacked): fc_0 weight split into net-half (wa) / pooled-half (wb)
        "wa_t":   w((4, H, H)),
        "wb_t":   w((4, H, H)),
        "bf0":    w((4, H)),
        "wf1_t":  w((4, H, H)),
        "bf1":    w((4, H)),
        "sa_t":   w((4, H, H)),
        "sb_t":   w((4, H, H)),
        # fc_c: Linear(H, C)
        "wc_t":   w((H, C)),
        "bc":     w((1, C)),
    }
    return params


# ----------------------------------------------------------------------------
# Pure-JAX f32 reference (mirrors the PyTorch forward, including the explicit
# concat of [net, pooled]) — used to validate the kernel.
# ----------------------------------------------------------------------------
def ref_forward(p, P):
    def lin(x, wt, b=None):
        y = jnp.einsum("...i,io->...o", x, wt)
        return y if b is None else y + b

    relu = jax.nn.relu

    net = lin(p, P["wpos_t"], P["bpos"])                     # (B, N, 2H)

    # block_0
    h = lin(relu(net), P["w0f0_t"], P["b0f0"])
    dx = lin(relu(h), P["w0f1_t"], P["b0f1"])
    net = lin(net, P["w0sc_t"]) + dx                         # (B, N, H)

    for i in range(4):
        pooled = jnp.max(net, axis=1, keepdims=True)
        pooled = jnp.broadcast_to(pooled, net.shape)
        xcat = jnp.concatenate([net, pooled], axis=2)        # (B, N, 2H)
        wf0_t = jnp.concatenate([P["wa_t"][i], P["wb_t"][i]], axis=0)
        wsc_t = jnp.concatenate([P["sa_t"][i], P["sb_t"][i]], axis=0)
        h = lin(relu(xcat), wf0_t, P["bf0"][i])
        dx = lin(relu(h), P["wf1_t"][i], P["bf1"][i])
        net = lin(xcat, wsc_t) + dx

    net_f = net
    pooled = jnp.max(net, axis=1)                            # (B, H)
    c = lin(relu(pooled), P["wc_t"], P["bc"])                # (B, C)
    return c, net_f


# ----------------------------------------------------------------------------
if __name__ == "__main__":
    # Small shapes consistent with the module's forward.
    B, N, D = 2, 16, 3
    H, C = 32, 32

    key = jax.random.PRNGKey(0)
    kp, kw = jax.random.split(key)
    p = jax.random.normal(kp, (B, N, D), dtype=jnp.float32)
    params = init_params(kw, dim=D, hidden_dim=H, c_dim=C)

    c, net_f_list, _, _ = resnet_pointnet_forward(p, params)
    net_f = net_f_list[0]
    jax.block_until_ready((c, net_f))

    # Validate against the pure-JAX f32 reference (PyTorch-equivalent math).
    # Tolerance accounts for bf16 MXU operands (f32 accumulation is kept).
    c_ref, net_f_ref = ref_forward(p, params)
    assert c.shape == (B, C) and net_f.shape == (B, N, H)
    np.testing.assert_allclose(np.asarray(c), np.asarray(c_ref), rtol=3e-2, atol=3e-2)
    np.testing.assert_allclose(np.asarray(net_f), np.asarray(net_f_ref), rtol=3e-2, atol=3e-2)

    print("KERNEL_OK")
</pallas_src>

<mosaic_0001>
module attributes {stable_mosaic.version = 11 : i64} {
  func.func @_pointnet_kernel(%arg0: i32, %arg1: memref<2x16x3xf32, #tpu.memory_space<vmem>>, %arg2: memref<3x64xf32, #tpu.memory_space<vmem>>, %arg3: memref<1x64xf32, #tpu.memory_space<vmem>>, %arg4: memref<64x32xbf16, #tpu.memory_space<vmem>>, %arg5: memref<1x32xf32, #tpu.memory_space<vmem>>, %arg6: memref<32x32xbf16, #tpu.memory_space<vmem>>, %arg7: memref<1x32xf32, #tpu.memory_space<vmem>>, %arg8: memref<64x32xbf16, #tpu.memory_space<vmem>>, %arg9: memref<4x32x32xbf16, #tpu.memory_space<vmem>>, %arg10: memref<4x32x64xbf16, #tpu.memory_space<vmem>>, %arg11: memref<4x1x32xf32, #tpu.memory_space<vmem>>, %arg12: memref<4x32x32xbf16, #tpu.memory_space<vmem>>, %arg13: memref<4x1x32xf32, #tpu.memory_space<vmem>>, %arg14: memref<4x32x32xbf16, #tpu.memory_space<vmem>>, %arg15: memref<32x32xbf16, #tpu.memory_space<vmem>>, %arg16: memref<1x32xf32, #tpu.memory_space<vmem>>, %arg17: memref<2x1x32xf32, #tpu.memory_space<vmem>>, %arg18: memref<2x16x32xf32, #tpu.memory_space<vmem>>) attributes {dimension_semantics = [#tpu.dimension_semantics<parallel>], iteration_bounds = array<i64: 1>, scalar_prefetch = 0 : i64, scratch_operands = 0 : i64, tpu.core_type = #tpu.core_type<tc>, window_params = [{transform_indices = @transform_0, window_bounds = array<i64: 2, 16, 3>}, {pipeline_mode = #tpu.pipeline_mode<synchronous>, transform_indices = @transform_1, window_bounds = array<i64: 3, 64>}, {pipeline_mode = #tpu.pipeline_mode<synchronous>, transform_indices = @transform_2, window_bounds = array<i64: 1, 64>}, {pipeline_mode = #tpu.pipeline_mode<synchronous>, transform_indices = @transform_3, window_bounds = array<i64: 64, 32>}, {pipeline_mode = #tpu.pipeline_mode<synchronous>, transform_indices = @transform_4, window_bounds = array<i64: 1, 32>}, {pipeline_mode = #tpu.pipeline_mode<synchronous>, transform_indices = @transform_5, window_bounds = array<i64: 32, 32>}, {pipeline_mode = #tpu.pipeline_mode<synchronous>, transform_indices = @transform_6, window_bounds = array<i64: 1, 32>}, {pipeline_mode = #tpu.pipeline_mode<synchronous>, transform_indices = @transform_7, window_bounds = array<i64: 64, 32>}, {pipeline_mode = #tpu.pipeline_mode<synchronous>, transform_indices = @transform_8, window_bounds = array<i64: 4, 32, 32>}, {pipeline_mode = #tpu.pipeline_mode<synchronous>, transform_indices = @transform_9, window_bounds = array<i64: 4, 32, 64>}, {pipeline_mode = #tpu.pipeline_mode<synchronous>, transform_indices = @transform_10, window_bounds = array<i64: 4, 1, 32>}, {pipeline_mode = #tpu.pipeline_mode<synchronous>, transform_indices = @transform_11, window_bounds = array<i64: 4, 32, 32>}, {pipeline_mode = #tpu.pipeline_mode<synchronous>, transform_indices = @transform_12, window_bounds = array<i64: 4, 1, 32>}, {pipeline_mode = #tpu.pipeline_mode<synchronous>, transform_indices = @transform_13, window_bounds = array<i64: 4, 32, 32>}, {pipeline_mode = #tpu.pipeline_mode<synchronous>, transform_indices = @transform_14, window_bounds = array<i64: 32, 32>}, {pipeline_mode = #tpu.pipeline_mode<synchronous>, transform_indices = @transform_15, window_bounds = array<i64: 1, 32>}, {transform_indices = @transform_16, window_bounds = array<i64: 2, 1, 32>}, {transform_indices = @transform_17, window_bounds = array<i64: 2, 16, 32>}]} {
    %c0 = arith.constant 0 : index
    %c0_0 = arith.constant 0 : index
    %c0_1 = arith.constant 0 : index
    %0 = vector.load %arg1[%c0, %c0_0, %c0_1] : memref<2x16x3xf32, #tpu.memory_space<vmem>>, vector<2x16x3xf32>
    %1 = vector.shape_cast %0 : vector<2x16x3xf32> to vector<32x3xf32>
    %2 = vector.extract_strided_slice %1 {offsets = [0, 0], sizes = [32, 1], strides = [1, 1]} : vector<32x3xf32> to vector<32x1xf32>
    %c0_2 = arith.constant 0 : index
    %c0_3 = arith.constant 0 : index
    %3 = vector.load %arg2[%c0_2, %c0_3] : memref<3x64xf32, #tpu.memory_space<vmem>>, vector<1x64xf32>
    %4 = vector.broadcast %2 : vector<32x1xf32> to vector<32x64xf32>
    %5 = vector.broadcast %3 : vector<1x64xf32> to vector<32x64xf32>
    %6 = arith.mulf %4, %5 : vector<32x64xf32>
    %c0_4 = arith.constant 0 : index
    %c0_5 = arith.constant 0 : index
    %7 = vector.load %arg3[%c0_4, %c0_5] : memref<1x64xf32, #tpu.memory_space<vmem>>, vector<1x64xf32>
    %8 = vector.broadcast %7 : vector<1x64xf32> to vector<32x64xf32>
    %9 = arith.addf %6, %8 : vector<32x64xf32>
    %10 = vector.extract_strided_slice %1 {offsets = [0, 1], sizes = [32, 1], strides = [1, 1]} : vector<32x3xf32> to vector<32x1xf32>
    %c1 = arith.constant 1 : index
    %c0_6 = arith.constant 0 : index
    %11 = vector.load %arg2[%c1, %c0_6] : memref<3x64xf32, #tpu.memory_space<vmem>>, vector<1x64xf32>
    %12 = vector.broadcast %10 : vector<32x1xf32> to vector<32x64xf32>
    %13 = vector.broadcast %11 : vector<1x64xf32> to vector<32x64xf32>
    %14 = arith.mulf %12, %13 : vector<32x64xf32>
    %15 = arith.addf %9, %14 : vector<32x64xf32>
    %16 = vector.extract_strided_slice %1 {offsets = [0, 2], sizes = [32, 1], strides = [1, 1]} : vector<32x3xf32> to vector<32x1xf32>
    %c2 = arith.constant 2 : index
    %c0_7 = arith.constant 0 : index
    %17 = vector.load %arg2[%c2, %c0_7] : memref<3x64xf32, #tpu.memory_space<vmem>>, vector<1x64xf32>
    %18 = vector.broadcast %16 : vector<32x1xf32> to vector<32x64xf32>
    %19 = vector.broadcast %17 : vector<1x64xf32> to vector<32x64xf32>
    %20 = arith.mulf %18, %19 : vector<32x64xf32>
    %21 = arith.addf %15, %20 : vector<32x64xf32>
    %22 = vector.shape_cast %21 : vector<32x64xf32> to vector<2x16x64xf32>
    %cst = arith.constant 0.000000e+00 : f32
    %23 = vector.broadcast %cst : f32 to vector<2x16x64xf32>
    %24 = arith.maximumf %22, %23 : vector<2x16x64xf32>
    %c0_8 = arith.constant 0 : index
    %c0_9 = arith.constant 0 : index
    %25 = vector.load %arg4[%c0_8, %c0_9] : memref<64x32xbf16, #tpu.memory_space<vmem>>, vector<64x32xbf16>
    %26 = vector.shape_cast %24 : vector<2x16x64xf32> to vector<32x64xf32>
    %27 = arith.truncf %26 : vector<32x64xf32> to vector<32x64xbf16>
    %cst_10 = arith.constant dense<0.000000e+00> : vector<32x32xf32>
    %28 = tpu.matmul %27, %25, %cst_10 {dimension_numbers = #tpu.dot_dimension_numbers<[1], [0], [0], [1], [0, 0, 1, 1], [], []>} : vector<32x64xbf16>, vector<64x32xbf16>, vector<32x32xf32> -> vector<32x32xf32>
    %29 = vector.shape_cast %28 : vector<32x32xf32> to vector<2x16x32xf32>
    %c0_11 = arith.constant 0 : index
    %c0_12 = arith.constant 0 : index
    %30 = vector.load %arg5[%c0_11, %c0_12] : memref<1x32xf32, #tpu.memory_space<vmem>>, vector<1x32xf32>
    %31 = vector.shape_cast %30 : vector<1x32xf32> to vector<1x1x32xf32>
    %32 = vector.broadcast %31 : vector<1x1x32xf32> to vector<2x16x32xf32>
    %33 = arith.addf %29, %32 : vector<2x16x32xf32>
    %cst_13 = arith.constant 0.000000e+00 : f32
    %34 = vector.broadcast %cst_13 : f32 to vector<2x16x32xf32>
    %35 = arith.maximumf %33, %34 : vector<2x16x32xf32>
    %c0_14 = arith.constant 0 : index
    %c0_15 = arith.constant 0 : index
    %36 = vector.load %arg6[%c0_14, %c0_15] : memref<32x32xbf16, #tpu.memory_space<vmem>>, vector<32x32xbf16>
    %37 = vector.shape_cast %35 : vector<2x16x32xf32> to vector<32x32xf32>
    %38 = arith.truncf %37 : vector<32x32xf32> to vector<32x32xbf16>
    %cst_16 = arith.constant dense<0.000000e+00> : vector<32x32xf32>
    %39 = tpu.matmul %38, %36, %cst_16 {dimension_numbers = #tpu.dot_dimension_numbers<[1], [0], [0], [1], [0, 0, 1, 1], [], []>} : vector<32x32xbf16>, vector<32x32xbf16>, vector<32x32xf32> -> vector<32x32xf32>
    %40 = vector.shape_cast %39 : vector<32x32xf32> to vector<2x16x32xf32>
    %c0_17 = arith.constant 0 : index
    %c0_18 = arith.constant 0 : index
    %41 = vector.load %arg7[%c0_17, %c0_18] : memref<1x32xf32, #tpu.memory_space<vmem>>, vector<1x32xf32>
    %42 = vector.shape_cast %41 : vector<1x32xf32> to vector<1x1x32xf32>
    %43 = vector.broadcast %42 : vector<1x1x32xf32> to vector<2x16x32xf32>
    %44 = arith.addf %40, %43 : vector<2x16x32xf32>
    %c0_19 = arith.constant 0 : index
    %c0_20 = arith.constant 0 : index
    %45 = vector.load %arg8[%c0_19, %c0_20] : memref<64x32xbf16, #tpu.memory_space<vmem>>, vector<64x32xbf16>
    %46 = vector.shape_cast %22 : vector<2x16x64xf32> to vector<32x64xf32>
    %47 = arith.truncf %46 : vector<32x64xf32> to vector<32x64xbf16>
    %cst_21 = arith.constant dense<0.000000e+00> : vector<32x32xf32>
    %48 = tpu.matmul %47, %45, %cst_21 {dimension_numbers = #tpu.dot_dimension_numbers<[1], [0], [0], [1], [0, 0, 1, 1], [], []>} : vector<32x64xbf16>, vector<64x32xbf16>, vector<32x32xf32> -> vector<32x32xf32>
    %49 = vector.shape_cast %48 : vector<32x32xf32> to vector<2x16x32xf32>
    %50 = arith.addf %49, %44 : vector<2x16x32xf32>
    %c0_i32 = arith.constant 0 : i32
    %cst_22 = arith.constant dense<0xFF800000> : vector<2x32xf32>
    %51 = vector.multi_reduction <maximumf>, %50, %cst_22 [1] : vector<2x16x32xf32> to vector<2x32xf32>
    %cst_23 = arith.constant 0.000000e+00 : f32
    %52 = vector.broadcast %cst_23 : f32 to vector<2x32xf32>
    %53 = arith.maximumf %51, %52 : vector<2x32xf32>
    %54 = tpu.concatenate %53, %51 in 0 : vector<2x32xf32>, vector<2x32xf32> -> vector<4x32xf32>
    %55 = arith.truncf %54 : vector<4x32xf32> to vector<4x32xbf16>
    %56 = arith.index_cast %c0_i32 : i32 to index
    %c0_24 = arith.constant 0 : index
    %c0_25 = arith.constant 0 : index
    %57 = vector.load %arg10[%56, %c0_24, %c0_25] : memref<4x32x64xbf16, #tpu.memory_space<vmem>>, vector<1x32x64xbf16>
    %58 = vector.shape_cast %57 : vector<1x32x64xbf16> to vector<32x64xbf16>
    %cst_26 = arith.constant dense<0.000000e+00> : vector<4x64xf32>
    %59 = tpu.matmul %55, %58, %cst_26 {dimension_numbers = #tpu.dot_dimension_numbers<[1], [0], [0], [1], [0, 0, 1, 1], [], []>} : vector<4x32xbf16>, vector<32x64xbf16>, vector<4x64xf32> -> vector<4x64xf32>
    %60 = vector.extract_strided_slice %59 {offsets = [0, 0], sizes = [2, 32], strides = [1, 1]} : vector<4x64xf32> to vector<2x32xf32>
    %61 = vector.shape_cast %60 : vector<2x32xf32> to vector<2x1x32xf32>
    %62 = vector.extract_strided_slice %59 {offsets = [2, 32], sizes = [2, 32], strides = [1, 1]} : vector<4x64xf32> to vector<2x32xf32>
    %63 = vector.shape_cast %62 : vector<2x32xf32> to vector<2x1x32xf32>
    %cst_27 = arith.constant 0.000000e+00 : f32
    %64 = vector.broadcast %cst_27 : f32 to vector<2x16x32xf32>
    %65 = arith.maximumf %50, %64 : vector<2x16x32xf32>
    %66 = arith.index_cast %c0_i32 : i32 to index
    %c0_28 = arith.constant 0 : index
    %c0_29 = arith.constant 0 : index
    %67 = vector.load %arg9[%66, %c0_28, %c0_29] : memref<4x32x32xbf16, #tpu.memory_space<vmem>>, vector<1x32x32xbf16>
    %68 = vector.shape_cast %67 : vector<1x32x32xbf16> to vector<32x32xbf16>
    %69 = vector.shape_cast %65 : vector<2x16x32xf32> to vector<32x32xf32>
    %70 = arith.truncf %69 : vector<32x32xf32> to vector<32x32xbf16>
    %cst_30 = arith.constant dense<0.000000e+00> : vector<32x32xf32>
    %71 = tpu.matmul %70, %68, %cst_30 {dimension_numbers = #tpu.dot_dimension_numbers<[1], [0], [0], [1], [0, 0, 1, 1], [], []>} : vector<32x32xbf16>, vector<32x32xbf16>, vector<32x32xf32> -> vector<32x32xf32>
    %72 = vector.shape_cast %71 : vector<32x32xf32> to vector<2x16x32xf32>
    %73 = vector.broadcast %61 : vector<2x1x32xf32> to vector<2x16x32xf32>
    %74 = arith.addf %72, %73 : vector<2x16x32xf32>
    %75 = arith.index_cast %c0_i32 : i32 to index
    %c0_31 = arith.constant 0 : index
    %c0_32 = arith.constant 0 : index
    %76 = vector.load %arg11[%75, %c0_31, %c0_32] : memref<4x1x32xf32, #tpu.memory_space<vmem>>, vector<1x1x32xf32>
    %77 = vector.shape_cast %76 : vector<1x1x32xf32> to vector<1x32xf32>
    %78 = vector.shape_cast %77 : vector<1x32xf32> to vector<1x1x32xf32>
    %79 = vector.broadcast %78 : vector<1x1x32xf32> to vector<2x16x32xf32>
    %80 = arith.addf %74, %79 : vector<2x16x32xf32>
    %cst_33 = arith.constant 0.000000e+00 : f32
    %81 = vector.broadcast %cst_33 : f32 to vector<2x16x32xf32>
    %82 = arith.maximumf %80, %81 : vector<2x16x32xf32>
    %83 = arith.index_cast %c0_i32 : i32 to index
    %c0_34 = arith.constant 0 : index
    %c0_35 = arith.constant 0 : index
    %84 = vector.load %arg12[%83, %c0_34, %c0_35] : memref<4x32x32xbf16, #tpu.memory_space<vmem>>, vector<1x32x32xbf16>
    %85 = vector.shape_cast %84 : vector<1x32x32xbf16> to vector<32x32xbf16>
    %86 = vector.shape_cast %82 : vector<2x16x32xf32> to vector<32x32xf32>
    %87 = arith.truncf %86 : vector<32x32xf32> to vector<32x32xbf16>
    %cst_36 = arith.constant dense<0.000000e+00> : vector<32x32xf32>
    %88 = tpu.matmul %87, %85, %cst_36 {dimension_numbers = #tpu.dot_dimension_numbers<[1], [0], [0], [1], [0, 0, 1, 1], [], []>} : vector<32x32xbf16>, vector<32x32xbf16>, vector<32x32xf32> -> vector<32x32xf32>
    %89 = vector.shape_cast %88 : vector<32x32xf32> to vector<2x16x32xf32>
    %90 = arith.index_cast %c0_i32 : i32 to index
    %c0_37 = arith.constant 0 : index
    %c0_38 = arith.constant 0 : index
    %91 = vector.load %arg13[%90, %c0_37, %c0_38] : memref<4x1x32xf32, #tpu.memory_space<vmem>>, vector<1x1x32xf32>
    %92 = vector.shape_cast %91 : vector<1x1x32xf32> to vector<1x32xf32>
    %93 = vector.shape_cast %92 : vector<1x32xf32> to vector<1x1x32xf32>
    %94 = vector.broadcast %93 : vector<1x1x32xf32> to vector<2x16x32xf32>
    %95 = arith.addf %89, %94 : vector<2x16x32xf32>
    %96 = arith.index_cast %c0_i32 : i32 to index
    %c0_39 = arith.constant 0 : index
    %c0_40 = arith.constant 0 : index
    %97 = vector.load %arg14[%96, %c0_39, %c0_40] : memref<4x32x32xbf16, #tpu.memory_space<vmem>>, vector<1x32x32xbf16>
    %98 = vector.shape_cast %97 : vector<1x32x32xbf16> to vector<32x32xbf16>
    %99 = vector.shape_cast %50 : vector<2x16x32xf32> to vector<32x32xf32>
    %100 = arith.truncf %99 : vector<32x32xf32> to vector<32x32xbf16>
    %cst_41 = arith.constant dense<0.000000e+00> : vector<32x32xf32>
    %101 = tpu.matmul %100, %98, %cst_41 {dimension_numbers = #tpu.dot_dimension_numbers<[1], [0], [0], [1], [0, 0, 1, 1], [], []>} : vector<32x32xbf16>, vector<32x32xbf16>, vector<32x32xf32> -> vector<32x32xf32>
    %102 = vector.shape_cast %101 : vector<32x32xf32> to vector<2x16x32xf32>
    %103 = vector.broadcast %63 : vector<2x1x32xf32> to vector<2x16x32xf32>
    %104 = arith.addf %102, %103 : vector<2x16x32xf32>
    %105 = arith.addf %104, %95 : vector<2x16x32xf32>
    %c1_i32 = arith.constant 1 : i32
    %cst_42 = arith.constant dense<0xFF800000> : vector<2x32xf32>
    %106 = vector.multi_reduction <maximumf>, %105, %cst_42 [1] : vector<2x16x32xf32> to vector<2x32xf32>
    %cst_43 = arith.constant 0.000000e+00 : f32
    %107 = vector.broadcast %cst_43 : f32 to vector<2x32xf32>
    %108 = arith.maximumf %106, %107 : vector<2x32xf32>
    %109 = tpu.concatenate %108, %106 in 0 : vector<2x32xf32>, vector<2x32xf32> -> vector<4x32xf32>
    %110 = arith.truncf %109 : vector<4x32xf32> to vector<4x32xbf16>
    %111 = arith.index_cast %c1_i32 : i32 to index
    %c0_44 = arith.constant 0 : index
    %c0_45 = arith.constant 0 : index
    %112 = vector.load %arg10[%111, %c0_44, %c0_45] : memref<4x32x64xbf16, #tpu.memory_space<vmem>>, vector<1x32x64xbf16>
    %113 = vector.shape_cast %112 : vector<1x32x64xbf16> to vector<32x64xbf16>
    %cst_46 = arith.constant dense<0.000000e+00> : vector<4x64xf32>
    %114 = tpu.matmul %110, %113, %cst_46 {dimension_numbers = #tpu.dot_dimension_numbers<[1], [0], [0], [1], [0, 0, 1, 1], [], []>} : vector<4x32xbf16>, vector<32x64xbf16>, vector<4x64xf32> -> vector<4x64xf32>
    %115 = vector.extract_strided_slice %114 {offsets = [0, 0], sizes = [2, 32], strides = [1, 1]} : vector<4x64xf32> to vector<2x32xf32>
    %116 = vector.shape_cast %115 : vector<2x32xf32> to vector<2x1x32xf32>
    %117 = vector.extract_strided_slice %114 {offsets = [2, 32], sizes = [2, 32], strides = [1, 1]} : vector<4x64xf32> to vector<2x32xf32>
    %118 = vector.shape_cast %117 : vector<2x32xf32> to vector<2x1x32xf32>
    %cst_47 = arith.constant 0.000000e+00 : f32
    %119 = vector.broadcast %cst_47 : f32 to vector<2x16x32xf32>
    %120 = arith.maximumf %105, %119 : vector<2x16x32xf32>
    %121 = arith.index_cast %c1_i32 : i32 to index
    %c0_48 = arith.constant 0 : index
    %c0_49 = arith.constant 0 : index
    %122 = vector.load %arg9[%121, %c0_48, %c0_49] : memref<4x32x32xbf16, #tpu.memory_space<vmem>>, vector<1x32x32xbf16>
    %123 = vector.shape_cast %122 : vector<1x32x32xbf16> to vector<32x32xbf16>
    %124 = vector.shape_cast %120 : vector<2x16x32xf32> to vector<32x32xf32>
    %125 = arith.truncf %124 : vector<32x32xf32> to vector<32x32xbf16>
    %cst_50 = arith.constant dense<0.000000e+00> : vector<32x32xf32>
    %126 = tpu.matmul %125, %123, %cst_50 {dimension_numbers = #tpu.dot_dimension_numbers<[1], [0], [0], [1], [0, 0, 1, 1], [], []>} : vector<32x32xbf16>, vector<32x32xbf16>, vector<32x32xf32> -> vector<32x32xf32>
    %127 = vector.shape_cast %126 : vector<32x32xf32> to vector<2x16x32xf32>
    %128 = vector.broadcast %116 : vector<2x1x32xf32> to vector<2x16x32xf32>
    %129 = arith.addf %127, %128 : vector<2x16x32xf32>
    %130 = arith.index_cast %c1_i32 : i32 to index
    %c0_51 = arith.constant 0 : index
    %c0_52 = arith.constant 0 : index
    %131 = vector.load %arg11[%130, %c0_51, %c0_52] : memref<4x1x32xf32, #tpu.memory_space<vmem>>, vector<1x1x32xf32>
    %132 = vector.shape_cast %131 : vector<1x1x32xf32> to vector<1x32xf32>
    %133 = vector.shape_cast %132 : vector<1x32xf32> to vector<1x1x32xf32>
    %134 = vector.broadcast %133 : vector<1x1x32xf32> to vector<2x16x32xf32>
    %135 = arith.addf %129, %134 : vector<2x16x32xf32>
    %cst_53 = arith.constant 0.000000e+00 : f32
    %136 = vector.broadcast %cst_53 : f32 to vector<2x16x32xf32>
    %137 = arith.maximumf %135, %136 : vector<2x16x32xf32>
    %138 = arith.index_cast %c1_i32 : i32 to index
    %c0_54 = arith.constant 0 : index
    %c0_55 = arith.constant 0 : index
    %139 = vector.load %arg12[%138, %c0_54, %c0_55] : memref<4x32x32xbf16, #tpu.memory_space<vmem>>, vector<1x32x32xbf16>
    %140 = vector.shape_cast %139 : vector<1x32x32xbf16> to vector<32x32xbf16>
    %141 = vector.shape_cast %137 : vector<2x16x32xf32> to vector<32x32xf32>
    %142 = arith.truncf %141 : vector<32x32xf32> to vector<32x32xbf16>
    %cst_56 = arith.constant dense<0.000000e+00> : vector<32x32xf32>
    %143 = tpu.matmul %142, %140, %cst_56 {dimension_numbers = #tpu.dot_dimension_numbers<[1], [0], [0], [1], [0, 0, 1, 1], [], []>} : vector<32x32xbf16>, vector<32x32xbf16>, vector<32x32xf32> -> vector<32x32xf32>
    %144 = vector.shape_cast %143 : vector<32x32xf32> to vector<2x16x32xf32>
    %145 = arith.index_cast %c1_i32 : i32 to index
    %c0_57 = arith.constant 0 : index
    %c0_58 = arith.constant 0 : index
    %146 = vector.load %arg13[%145, %c0_57, %c0_58] : memref<4x1x32xf32, #tpu.memory_space<vmem>>, vector<1x1x32xf32>
    %147 = vector.shape_cast %146 : vector<1x1x32xf32> to vector<1x32xf32>
    %148 = vector.shape_cast %147 : vector<1x32xf32> to vector<1x1x32xf32>
    %149 = vector.broadcast %148 : vector<1x1x32xf32> to vector<2x16x32xf32>
    %150 = arith.addf %144, %149 : vector<2x16x32xf32>
    %151 = arith.index_cast %c1_i32 : i32 to index
    %c0_59 = arith.constant 0 : index
    %c0_60 = arith.constant 0 : index
    %152 = vector.load %arg14[%151, %c0_59, %c0_60] : memref<4x32x32xbf16, #tpu.memory_space<vmem>>, vector<1x32x32xbf16>
    %153 = vector.shape_cast %152 : vector<1x32x32xbf16> to vector<32x32xbf16>
    %154 = vector.shape_cast %105 : vector<2x16x32xf32> to vector<32x32xf32>
    %155 = arith.truncf %154 : vector<32x32xf32> to vector<32x32xbf16>
    %cst_61 = arith.constant dense<0.000000e+00> : vector<32x32xf32>
    %156 = tpu.matmul %155, %153, %cst_61 {dimension_numbers = #tpu.dot_dimension_numbers<[1], [0], [0], [1], [0, 0, 1, 1], [], []>} : vector<32x32xbf16>, vector<32x32xbf16>, vector<32x32xf32> -> vector<32x32xf32>
    %157 = vector.shape_cast %156 : vector<32x32xf32> to vector<2x16x32xf32>
    %158 = vector.broadcast %118 : vector<2x1x32xf32> to vector<2x16x32xf32>
    %159 = arith.addf %157, %158 : vector<2x16x32xf32>
    %160 = arith.addf %159, %150 : vector<2x16x32xf32>
    %c2_i32 = arith.constant 2 : i32
    %cst_62 = arith.constant dense<0xFF800000> : vector<2x32xf32>
    %161 = vector.multi_reduction <maximumf>, %160, %cst_62 [1] : vector<2x16x32xf32> to vector<2x32xf32>
    %cst_63 = arith.constant 0.000000e+00 : f32
    %162 = vector.broadcast %cst_63 : f32 to vector<2x32xf32>
    %163 = arith.maximumf %161, %162 : vector<2x32xf32>
    %164 = tpu.concatenate %163, %161 in 0 : vector<2x32xf32>, vector<2x32xf32> -> vector<4x32xf32>
    %165 = arith.truncf %164 : vector<4x32xf32> to vector<4x32xbf16>
    %166 = arith.index_cast %c2_i32 : i32 to index
    %c0_64 = arith.constant 0 : index
    %c0_65 = arith.constant 0 : index
    %167 = vector.load %arg10[%166, %c0_64, %c0_65] : memref<4x32x64xbf16, #tpu.memory_space<vmem>>, vector<1x32x64xbf16>
    %168 = vector.shape_cast %167 : vector<1x32x64xbf16> to vector<32x64xbf16>
    %cst_66 = arith.constant dense<0.000000e+00> : vector<4x64xf32>
    %169 = tpu.matmul %165, %168, %cst_66 {dimension_numbers = #tpu.dot_dimension_numbers<[1], [0], [0], [1], [0, 0, 1, 1], [], []>} : vector<4x32xbf16>, vector<32x64xbf16>, vector<4x64xf32> -> vector<4x64xf32>
    %170 = vector.extract_strided_slice %169 {offsets = [0, 0], sizes = [2, 32], strides = [1, 1]} : vector<4x64xf32> to vector<2x32xf32>
    %171 = vector.shape_cast %170 : vector<2x32xf32> to vector<2x1x32xf32>
    %172 = vector.extract_strided_slice %169 {offsets = [2, 32], sizes = [2, 32], strides = [1, 1]} : vector<4x64xf32> to vector<2x32xf32>
    %173 = vector.shape_cast %172 : vector<2x32xf32> to vector<2x1x32xf32>
    %cst_67 = arith.constant 0.000000e+00 : f32
    %174 = vector.broadcast %cst_67 : f32 to vector<2x16x32xf32>
    %175 = arith.maximumf %160, %174 : vector<2x16x32xf32>
    %176 = arith.index_cast %c2_i32 : i32 to index
    %c0_68 = arith.constant 0 : index
    %c0_69 = arith.constant 0 : index
    %177 = vector.load %arg9[%176, %c0_68, %c0_69] : memref<4x32x32xbf16, #tpu.memory_space<vmem>>, vector<1x32x32xbf16>
    %178 = vector.shape_cast %177 : vector<1x32x32xbf16> to vector<32x32xbf16>
    %179 = vector.shape_cast %175 : vector<2x16x32xf32> to vector<32x32xf32>
    %180 = arith.truncf %179 : vector<32x32xf32> to vector<32x32xbf16>
    %cst_70 = arith.constant dense<0.000000e+00> : vector<32x32xf32>
    %181 = tpu.matmul %180, %178, %cst_70 {dimension_numbers = #tpu.dot_dimension_numbers<[1], [0], [0], [1], [0, 0, 1, 1], [], []>} : vector<32x32xbf16>, vector<32x32xbf16>, vector<32x32xf32> -> vector<32x32xf32>
    %182 = vector.shape_cast %181 : vector<32x32xf32> to vector<2x16x32xf32>
    %183 = vector.broadcast %171 : vector<2x1x32xf32> to vector<2x16x32xf32>
    %184 = arith.addf %182, %183 : vector<2x16x32xf32>
    %185 = arith.index_cast %c2_i32 : i32 to index
    %c0_71 = arith.constant 0 : index
    %c0_72 = arith.constant 0 : index
    %186 = vector.load %arg11[%185, %c0_71, %c0_72] : memref<4x1x32xf32, #tpu.memory_space<vmem>>, vector<1x1x32xf32>
    %187 = vector.shape_cast %186 : vector<1x1x32xf32> to vector<1x32xf32>
    %188 = vector.shape_cast %187 : vector<1x32xf32> to vector<1x1x32xf32>
    %189 = vector.broadcast %188 : vector<1x1x32xf32> to vector<2x16x32xf32>
    %190 = arith.addf %184, %189 : vector<2x16x32xf32>
    %cst_73 = arith.constant 0.000000e+00 : f32
    %191 = vector.broadcast %cst_73 : f32 to vector<2x16x32xf32>
    %192 = arith.maximumf %190, %191 : vector<2x16x32xf32>
    %193 = arith.index_cast %c2_i32 : i32 to index
    %c0_74 = arith.constant 0 : index
    %c0_75 = arith.constant 0 : index
    %194 = vector.load %arg12[%193, %c0_74, %c0_75] : memref<4x32x32xbf16, #tpu.memory_space<vmem>>, vector<1x32x32xbf16>
    %195 = vector.shape_cast %194 : vector<1x32x32xbf16> to vector<32x32xbf16>
    %196 = vector.shape_cast %192 : vector<2x16x32xf32> to vector<32x32xf32>
    %197 = arith.truncf %196 : vector<32x32xf32> to vector<32x32xbf16>
    %cst_76 = arith.constant dense<0.000000e+00> : vector<32x32xf32>
    %198 = tpu.matmul %197, %195, %cst_76 {dimension_numbers = #tpu.dot_dimension_numbers<[1], [0], [0], [1], [0, 0, 1, 1], [], []>} : vector<32x32xbf16>, vector<32x32xbf16>, vector<32x32xf32> -> vector<32x32xf32>
    %199 = vector.shape_cast %198 : vector<32x32xf32> to vector<2x16x32xf32>
    %200 = arith.index_cast %c2_i32 : i32 to index
    %c0_77 = arith.constant 0 : index
    %c0_78 = arith.constant 0 : index
    %201 = vector.load %arg13[%200, %c0_77, %c0_78] : memref<4x1x32xf32, #tpu.memory_space<vmem>>, vector<1x1x32xf32>
    %202 = vector.shape_cast %201 : vector<1x1x32xf32> to vector<1x32xf32>
    %203 = vector.shape_cast %202 : vector<1x32xf32> to vector<1x1x32xf32>
    %204 = vector.broadcast %203 : vector<1x1x32xf32> to vector<2x16x32xf32>
    %205 = arith.addf %199, %204 : vector<2x16x32xf32>
    %206 = arith.index_cast %c2_i32 : i32 to index
    %c0_79 = arith.constant 0 : index
    %c0_80 = arith.constant 0 : index
    %207 = vector.load %arg14[%206, %c0_79, %c0_80] : memref<4x32x32xbf16, #tpu.memory_space<vmem>>, vector<1x32x32xbf16>
    %208 = vector.shape_cast %207 : vector<1x32x32xbf16> to vector<32x32xbf16>
    %209 = vector.shape_cast %160 : vector<2x16x32xf32> to vector<32x32xf32>
    %210 = arith.truncf %209 : vector<32x32xf32> to vector<32x32xbf16>
    %cst_81 = arith.constant dense<0.000000e+00> : vector<32x32xf32>
    %211 = tpu.matmul %210, %208, %cst_81 {dimension_numbers = #tpu.dot_dimension_numbers<[1], [0], [0], [1], [0, 0, 1, 1], [], []>} : vector<32x32xbf16>, vector<32x32xbf16>, vector<32x32xf32> -> vector<32x32xf32>
    %212 = vector.shape_cast %211 : vector<32x32xf32> to vector<2x16x32xf32>
    %213 = vector.broadcast %173 : vector<2x1x32xf32> to vector<2x16x32xf32>
    %214 = arith.addf %212, %213 : vector<2x16x32xf32>
    %215 = arith.addf %214, %205 : vector<2x16x32xf32>
    %c3_i32 = arith.constant 3 : i32
    %cst_82 = arith.constant dense<0xFF800000> : vector<2x32xf32>
    %216 = vector.multi_reduction <maximumf>, %215, %cst_82 [1] : vector<2x16x32xf32> to vector<2x32xf32>
    %cst_83 = arith.constant 0.000000e+00 : f32
    %217 = vector.broadcast %cst_83 : f32 to vector<2x32xf32>
    %218 = arith.maximumf %216, %217 : vector<2x32xf32>
    %219 = tpu.concatenate %218, %216 in 0 : vector<2x32xf32>, vector<2x32xf32> -> vector<4x32xf32>
    %220 = arith.truncf %219 : vector<4x32xf32> to vector<4x32xbf16>
    %221 = arith.index_cast %c3_i32 : i32 to index
    %c0_84 = arith.constant 0 : index
    %c0_85 = arith.constant 0 : index
    %222 = vector.load %arg10[%221, %c0_84, %c0_85] : memref<4x32x64xbf16, #tpu.memory_space<vmem>>, vector<1x32x64xbf16>
    %223 = vector.shape_cast %222 : vector<1x32x64xbf16> to vector<32x64xbf16>
    %cst_86 = arith.constant dense<0.000000e+00> : vector<4x64xf32>
    %224 = tpu.matmul %220, %223, %cst_86 {dimension_numbers = #tpu.dot_dimension_numbers<[1], [0], [0], [1], [0, 0, 1, 1], [], []>} : vector<4x32xbf16>, vector<32x64xbf16>, vector<4x64xf32> -> vector<4x64xf32>
    %225 = vector.extract_strided_slice %224 {offsets = [0, 0], sizes = [2, 32], strides = [1, 1]} : vector<4x64xf32> to vector<2x32xf32>
    %226 = vector.shape_cast %225 : vector<2x32xf32> to vector<2x1x32xf32>
    %227 = vector.extract_strided_slice %224 {offsets = [2, 32], sizes = [2, 32], strides = [1, 1]} : vector<4x64xf32> to vector<2x32xf32>
    %228 = vector.shape_cast %227 : vector<2x32xf32> to vector<2x1x32xf32>
    %cst_87 = arith.constant 0.000000e+00 : f32
    %229 = vector.broadcast %cst_87 : f32 to vector<2x16x32xf32>
    %230 = arith.maximumf %215, %229 : vector<2x16x32xf32>
    %231 = arith.index_cast %c3_i32 : i32 to index
    %c0_88 = arith.constant 0 : index
    %c0_89 = arith.constant 0 : index
    %232 = vector.load %arg9[%231, %c0_88, %c0_89] : memref<4x32x32xbf16, #tpu.memory_space<vmem>>, vector<1x32x32xbf16>
    %233 = vector.shape_cast %232 : vector<1x32x32xbf16> to vector<32x32xbf16>
    %234 = vector.shape_cast %230 : vector<2x16x32xf32> to vector<32x32xf32>
    %235 = arith.truncf %234 : vector<32x32xf32> to vector<32x32xbf16>
    %cst_90 = arith.constant dense<0.000000e+00> : vector<32x32xf32>
    %236 = tpu.matmul %235, %233, %cst_90 {dimension_numbers = #tpu.dot_dimension_numbers<[1], [0], [0], [1], [0, 0, 1, 1], [], []>} : vector<32x32xbf16>, vector<32x32xbf16>, vector<32x32xf32> -> vector<32x32xf32>
    %237 = vector.shape_cast %236 : vector<32x32xf32> to vector<2x16x32xf32>
    %238 = vector.broadcast %226 : vector<2x1x32xf32> to vector<2x16x32xf32>
    %239 = arith.addf %237, %238 : vector<2x16x32xf32>
    %240 = arith.index_cast %c3_i32 : i32 to index
    %c0_91 = arith.constant 0 : index
    %c0_92 = arith.constant 0 : index
    %241 = vector.load %arg11[%240, %c0_91, %c0_92] : memref<4x1x32xf32, #tpu.memory_space<vmem>>, vector<1x1x32xf32>
    %242 = vector.shape_cast %241 : vector<1x1x32xf32> to vector<1x32xf32>
    %243 = vector.shape_cast %242 : vector<1x32xf32> to vector<1x1x32xf32>
    %244 = vector.broadcast %243 : vector<1x1x32xf32> to vector<2x16x32xf32>
    %245 = arith.addf %239, %244 : vector<2x16x32xf32>
    %cst_93 = arith.constant 0.000000e+00 : f32
    %246 = vector.broadcast %cst_93 : f32 to vector<2x16x32xf32>
    %247 = arith.maximumf %245, %246 : vector<2x16x32xf32>
    %248 = arith.index_cast %c3_i32 : i32 to index
    %c0_94 = arith.constant 0 : index
    %c0_95 = arith.constant 0 : index
    %249 = vector.load %arg12[%248, %c0_94, %c0_95] : memref<4x32x32xbf16, #tpu.memory_space<vmem>>, vector<1x32x32xbf16>
    %250 = vector.shape_cast %249 : vector<1x32x32xbf16> to vector<32x32xbf16>
    %251 = vector.shape_cast %247 : vector<2x16x32xf32> to vector<32x32xf32>
    %252 = arith.truncf %251 : vector<32x32xf32> to vector<32x32xbf16>
    %cst_96 = arith.constant dense<0.000000e+00> : vector<32x32xf32>
    %253 = tpu.matmul %252, %250, %cst_96 {dimension_numbers = #tpu.dot_dimension_numbers<[1], [0], [0], [1], [0, 0, 1, 1], [], []>} : vector<32x32xbf16>, vector<32x32xbf16>, vector<32x32xf32> -> vector<32x32xf32>
    %254 = vector.shape_cast %253 : vector<32x32xf32> to vector<2x16x32xf32>
    %255 = arith.index_cast %c3_i32 : i32 to index
    %c0_97 = arith.constant 0 : index
    %c0_98 = arith.constant 0 : index
    %256 = vector.load %arg13[%255, %c0_97, %c0_98] : memref<4x1x32xf32, #tpu.memory_space<vmem>>, vector<1x1x32xf32>
    %257 = vector.shape_cast %256 : vector<1x1x32xf32> to vector<1x32xf32>
    %258 = vector.shape_cast %257 : vector<1x32xf32> to vector<1x1x32xf32>
    %259 = vector.broadcast %258 : vector<1x1x32xf32> to vector<2x16x32xf32>
    %260 = arith.addf %254, %259 : vector<2x16x32xf32>
    %261 = arith.index_cast %c3_i32 : i32 to index
    %c0_99 = arith.constant 0 : index
    %c0_100 = arith.constant 0 : index
    %262 = vector.load %arg14[%261, %c0_99, %c0_100] : memref<4x32x32xbf16, #tpu.memory_space<vmem>>, vector<1x32x32xbf16>
    %263 = vector.shape_cast %262 : vector<1x32x32xbf16> to vector<32x32xbf16>
    %264 = vector.shape_cast %215 : vector<2x16x32xf32> to vector<32x32xf32>
    %265 = arith.truncf %264 : vector<32x32xf32> to vector<32x32xbf16>
    %cst_101 = arith.constant dense<0.000000e+00> : vector<32x32xf32>
    %266 = tpu.matmul %265, %263, %cst_101 {dimension_numbers = #tpu.dot_dimension_numbers<[1], [0], [0], [1], [0, 0, 1, 1], [], []>} : vector<32x32xbf16>, vector<32x32xbf16>, vector<32x32xf32> -> vector<32x32xf32>
    %267 = vector.shape_cast %266 : vector<32x32xf32> to vector<2x16x32xf32>
    %268 = vector.broadcast %228 : vector<2x1x32xf32> to vector<2x16x32xf32>
    %269 = arith.addf %267, %268 : vector<2x16x32xf32>
    %270 = arith.addf %269, %260 : vector<2x16x32xf32>
    %c4_i32 = arith.constant 4 : i32
    %c0_102 = arith.constant 0 : index
    %c0_103 = arith.constant 0 : index
    %c0_104 = arith.constant 0 : index
    %271 = vector.load %arg18[%c0_102, %c0_103, %c0_104] : memref<2x16x32xf32, #tpu.memory_space<vmem>>, vector<2x16x32xf32>
    tpu.vector_store %arg18[%c0_102, %c0_103, %c0_104], %270 {strides = array<i32>} : memref<2x16x32xf32, #tpu.memory_space<vmem>>, vector<2x16x32xf32>,
    %cst_105 = arith.constant dense<0xFF800000> : vector<2x32xf32>
    %272 = vector.multi_reduction <maximumf>, %270, %cst_105 [1] : vector<2x16x32xf32> to vector<2x32xf32>
    %cst_106 = arith.constant 0.000000e+00 : f32
    %273 = vector.broadcast %cst_106 : f32 to vector<2x32xf32>
    %274 = arith.maximumf %272, %273 : vector<2x32xf32>
    %275 = arith.truncf %274 : vector<2x32xf32> to vector<2x32xbf16>
    %c0_107 = arith.constant 0 : index
    %c0_108 = arith.constant 0 : index
    %276 = vector.load %arg15[%c0_107, %c0_108] : memref<32x32xbf16, #tpu.memory_space<vmem>>, vector<32x32xbf16>
    %cst_109 = arith.constant dense<0.000000e+00> : vector<2x32xf32>
    %277 = tpu.matmul %275, %276, %cst_109 {dimension_numbers = #tpu.dot_dimension_numbers<[1], [0], [0], [1], [0, 0, 1, 1], [], []>} : vector<2x32xbf16>, vector<32x32xbf16>, vector<2x32xf32> -> vector<2x32xf32>
    %c0_110 = arith.constant 0 : index
    %c0_111 = arith.constant 0 : index
    %278 = vector.load %arg16[%c0_110, %c0_111] : memref<1x32xf32, #tpu.memory_space<vmem>>, vector<1x32xf32>
    %279 = vector.broadcast %278 : vector<1x32xf32> to vector<2x32xf32>
    %280 = arith.addf %277, %279 : vector<2x32xf32>
    %281 = vector.shape_cast %280 : vector<2x32xf32> to vector<2x1x32xf32>
    %c0_112 = arith.constant 0 : index
    %c0_113 = arith.constant 0 : index
    %c0_114 = arith.constant 0 : index
    %282 = vector.load %arg17[%c0_112, %c0_113, %c0_114] : memref<2x1x32xf32, #tpu.memory_space<vmem>>, vector<2x1x32xf32>
    tpu.vector_store %arg17[%c0_112, %c0_113, %c0_114], %281 {strides = array<i32>} : memref<2x1x32xf32, #tpu.memory_space<vmem>>, vector<2x1x32xf32>,
    return
  }
  func.func @transform_0(%arg0: i32) -> (i32, i32, i32) {
    %c0_i32 = arith.constant 0 : i32
    %c0_i32_0 = arith.constant 0 : i32
    %c0_i32_1 = arith.constant 0 : i32
    return %arg0, %c0_i32, %c0_i32_0 : i32, i32, i32
  }
  func.func @transform_1(%arg0: i32) -> (i32, i32) {
    %c0_i32 = arith.constant 0 : i32
    %c0_i32_0 = arith.constant 0 : i32
    %c0_i32_1 = arith.constant 0 : i32
    return %c0_i32, %c0_i32_0 : i32, i32
  }
  func.func @transform_2(%arg0: i32) -> (i32, i32) {
    %c0_i32 = arith.constant 0 : i32
    %c0_i32_0 = arith.constant 0 : i32
    %c0_i32_1 = arith.constant 0 : i32
    return %c0_i32, %c0_i32_0 : i32, i32
  }
  func.func @transform_3(%arg0: i32) -> (i32, i32) {
    %c0_i32 = arith.constant 0 : i32
    %c0_i32_0 = arith.constant 0 : i32
    %c0_i32_1 = arith.constant 0 : i32
    return %c0_i32, %c0_i32_0 : i32, i32
  }
  func.func @transform_4(%arg0: i32) -> (i32, i32) {
    %c0_i32 = arith.constant 0 : i32
    %c0_i32_0 = arith.constant 0 : i32
    %c0_i32_1 = arith.constant 0 : i32
    return %c0_i32, %c0_i32_0 : i32, i32
  }
  func.func @transform_5(%arg0: i32) -> (i32, i32) {
    %c0_i32 = arith.constant 0 : i32
    %c0_i32_0 = arith.constant 0 : i32
    %c0_i32_1 = arith.constant 0 : i32
    return %c0_i32, %c0_i32_0 : i32, i32
  }
  func.func @transform_6(%arg0: i32) -> (i32, i32) {
    %c0_i32 = arith.constant 0 : i32
    %c0_i32_0 = arith.constant 0 : i32
    %c0_i32_1 = arith.constant 0 : i32
    return %c0_i32, %c0_i32_0 : i32, i32
  }
  func.func @transform_7(%arg0: i32) -> (i32, i32) {
    %c0_i32 = arith.constant 0 : i32
    %c0_i32_0 = arith.constant 0 : i32
    %c0_i32_1 = arith.constant 0 : i32
    return %c0_i32, %c0_i32_0 : i32, i32
  }
  func.func @transform_8(%arg0: i32) -> (i32, i32, i32) {
    %c0_i32 = arith.constant 0 : i32
    %c0_i32_0 = arith.constant 0 : i32
    %c0_i32_1 = arith.constant 0 : i32
    %c0_i32_2 = arith.constant 0 : i32
    return %c0_i32, %c0_i32_0, %c0_i32_1 : i32, i32, i32
  }
  func.func @transform_9(%arg0: i32) -> (i32, i32, i32) {
    %c0_i32 = arith.constant 0 : i32
    %c0_i32_0 = arith.constant 0 : i32
    %c0_i32_1 = arith.constant 0 : i32
    %c0_i32_2 = arith.constant 0 : i32
    return %c0_i32, %c0_i32_0, %c0_i32_1 : i32, i32, i32
  }
  func.func @transform_10(%arg0: i32) -> (i32, i32, i32) {
    %c0_i32 = arith.constant 0 : i32
    %c0_i32_0 = arith.constant 0 : i32
    %c0_i32_1 = arith.constant 0 : i32
    %c0_i32_2 = arith.constant 0 : i32
    return %c0_i32, %c0_i32_0, %c0_i32_1 : i32, i32, i32
  }
  func.func @transform_11(%arg0: i32) -> (i32, i32, i32) {
    %c0_i32 = arith.constant 0 : i32
    %c0_i32_0 = arith.constant 0 : i32
    %c0_i32_1 = arith.constant 0 : i32
    %c0_i32_2 = arith.constant 0 : i32
    return %c0_i32, %c0_i32_0, %c0_i32_1 : i32, i32, i32
  }
  func.func @transform_12(%arg0: i32) -> (i32, i32, i32) {
    %c0_i32 = arith.constant 0 : i32
    %c0_i32_0 = arith.constant 0 : i32
    %c0_i32_1 = arith.constant 0 : i32
    %c0_i32_2 = arith.constant 0 : i32
    return %c0_i32, %c0_i32_0, %c0_i32_1 : i32, i32, i32
  }
  func.func @transform_13(%arg0: i32) -> (i32, i32, i32) {
    %c0_i32 = arith.constant 0 : i32
    %c0_i32_0 = arith.constant 0 : i32
    %c0_i32_1 = arith.constant 0 : i32
    %c0_i32_2 = arith.constant 0 : i32
    return %c0_i32, %c0_i32_0, %c0_i32_1 : i32, i32, i32
  }
  func.func @transform_14(%arg0: i32) -> (i32, i32) {
    %c0_i32 = arith.constant 0 : i32
    %c0_i32_0 = arith.constant 0 : i32
    %c0_i32_1 = arith.constant 0 : i32
    return %c0_i32, %c0_i32_0 : i32, i32
  }
  func.func @transform_15(%arg0: i32) -> (i32, i32) {
    %c0_i32 = arith.constant 0 : i32
    %c0_i32_0 = arith.constant 0 : i32
    %c0_i32_1 = arith.constant 0 : i32
    return %c0_i32, %c0_i32_0 : i32, i32
  }
  func.func @transform_16(%arg0: i32) -> (i32, i32, i32) {
    %c0_i32 = arith.constant 0 : i32
    %c0_i32_0 = arith.constant 0 : i32
    %c0_i32_1 = arith.constant 0 : i32
    return %arg0, %c0_i32, %c0_i32_0 : i32, i32, i32
  }
  func.func @transform_17(%arg0: i32) -> (i32, i32, i32) {
    %c0_i32 = arith.constant 0 : i32
    %c0_i32_0 = arith.constant 0 : i32
    %c0_i32_1 = arith.constant 0 : i32
    return %arg0, %c0_i32, %c0_i32_0 : i32, i32, i32
  }
}

</mosaic_0001>

<bundles_post_ra>
// kernel: tpu_custom_call.1
= control target key start
LH: loop header
LB: loop body
LE: loop exit
PB: predicated region body
PF: predicated region fallthrough
CT: control target
= control target key end

     0   :  { %s3695_s0 = inlined_call_operand.vmem [shape: f32[2,16,3], index: 0, kind: input, shape index: {}]   ;;  %s3696_s1 = inlined_call_operand.hbm [shape: f32[3,64], index: 1, kind: input, shape index: {}]   ;;  %s3697_s2 = inlined_call_operand.hbm [shape: f32[1,64], index: 2, kind: input, shape index: {}]   ;;  %s3698_s3 = inlined_call_operand.vmem [shape: bf16[64,32], index: 3, kind: input, shape index: {}]   ;;  %s3699_s4 = inlined_call_operand.hbm [shape: f32[1,32], index: 4, kind: input, shape index: {}]   ;;  %s3700_s5 = inlined_call_operand.hbm [shape: bf16[32,32], index: 5, kind: input, shape index: {}]   ;;  %s3701_s6 = inlined_call_operand.hbm [shape: f32[1,32], index: 6, kind: input, shape index: {}]   ;;  %s3702_s7 = inlined_call_operand.vmem [shape: bf16[64,32], index: 7, kind: input, shape index: {}]   ;;  %s3703_s8 = inlined_call_operand.vmem [shape: bf16[4,32,32], index: 8, kind: input, shape index: {}]   ;;  %s3704_s9 = inlined_call_operand.vmem [shape: bf16[4,32,64], index: 9, kind: input, shape index: {}]   ;;  %s3705_s10 = inlined_call_operand.hbm [shape: f32[4,1,32], index: 10, kind: input, shape index: {}]   ;;  %s3706_s11 = inlined_call_operand.hbm [shape: bf16[4,32,32], index: 11, kind: input, shape index: {}]   ;;  %s3707_s12 = inlined_call_operand.hbm [shape: f32[4,1,32], index: 12, kind: input, shape index: {}]   ;;  %s3708_s13 = inlined_call_operand.hbm [shape: bf16[4,32,32], index: 13, kind: input, shape index: {}]   ;;  %s3709_s14 = inlined_call_operand.vmem [shape: bf16[32,32], index: 14, kind: input, shape index: {}]   ;;  %s3710_s15 = inlined_call_operand.vmem [shape: f32[1,32], index: 15, kind: input, shape index: {}]   ;;  %s3711_s16 = inlined_call_operand.hbm [shape: f32[2,1,32], index: 16, kind: output, shape index: {0}]   ;;  %s3712_s17 = inlined_call_operand.hbm [shape: f32[2,16,32], index: 17, kind: output, shape index: {1}]  }
   0x1   :  { %3717 = sst [smem:[#allocation27_spill]] %s3695_s0 }
   0x2   :  { %3718 = sst [smem:[#allocation28_spill]] %s3696_s1 }
   0x3   :  { %23 = vsyncpa [#allocation3], 0 }
   0x4   :  { %24 = vsyncpa [#allocation6], 0 }
   0x5   :  { %25 = vsyncpa [#allocation9], 0 }
   0x6   :  { %26 = vsyncpa [#allocation12], 0 }
   0x7   :  { %27 = vsyncpa [#allocation15], 0 }
   0x8   :  { %28 = vsyncpa [#allocation4], 0 }
   0x9   :  { %29 = vsyncpa [#allocation19], 0  ;;  %s3092_s24 = smov [#allocation5]   ;;  %s3093_s26 = smov [#allocation8]  }
   0xa   :  { %s48_s25 = sshll.u32 %s3092_s24, 4  ;;  %s69_s27 = sshll.u32 %s3093_s26, 4  ;;  %s49_s25 = int_to_ptr.vmem [resolvable:$true] %s48_s25  ;;  %s3206_s27 = int_to_ptr.vmem [resolvable:$true] %s69_s27 }
   0xb   :  { %s2836_s0 = scalar_lea.hbm %s3697_s2, 16 }
   0xc   :  { %p2837_p0 = scmp.ne.s32.totalorder %s3697_s2, %s2836_s0  ;;  %p2840_p1 = scmp.lt.u32.totalorder %s2836_s0, %s3697_s2 }
   0xe   :  { %p2842_p2 = pnand %p2840_p1, %p2837_p0 }
  0x10   :  { %2845 = shalt.err (!%p2842_p2)
}
  0x11   :  { %s2846_s20 = scalar_lea.vmem %s49_s25, 16  ;;  %s2850_s21 = scalar_lea.vmem %s49_s25, 32 }
  0x12   :  { %p2847_p3 = scmp.ne.s32.totalorder %s49_s25, %s2846_s20  ;;  %p2851_p4 = scmp.lt.s32.totalorder %s49_s25, %s49_s25 }
  0x13   :  { %p2852_p5 = scmp.lt.s32.totalorder %s2850_s21, %s2846_s20 }
  0x15   :  { %p2853_p6 = por %p2852_p5, %p2851_p4 }
  0x17   :  { %p2854_p7 = pnand %p2853_p6, %p2847_p3 }
  0x19   :  { %2857 = shalt.err (!%p2854_p7)
}
  0x1a   :  { %51 = dma.hbm_to_vmem [thread:$0]  %s3697_s2, 16, %s49_s25, [#allocation6]  }
  0x1b   :  { %s2858_s28 = scalar_lea.hbm %s3700_s5, 256 }
  0x1c   :  { %p2859_p8 = scmp.ne.s32.totalorder %s3700_s5, %s2858_s28  ;;  %p2862_p9 = scmp.lt.u32.totalorder %s2858_s28, %s3700_s5 }
  0x1e   :  { %p2864_p10 = pnand %p2862_p9, %p2859_p8 }
  0x20   :  { %2867 = shalt.err (!%p2864_p10)
}
  0x21   :  { %s2868_s19 = scalar_lea.vmem %s3206_s27, 256  ;;  %p2873_p12 = scmp.lt.s32.totalorder %s3206_s27, %s3206_s27 }
  0x22   :  { %p2869_p11 = scmp.ne.s32.totalorder %s3206_s27, %s2868_s19  ;;  %p2874_p13 = scmp.lt.s32.totalorder %s2868_s19, %s2868_s19 }
  0x24   :  { %p2875_p0 = por %p2874_p13, %p2873_p12 }
  0x26   :  { %p2876_p1 = pnand %p2875_p0, %p2869_p11 }
  0x28   :  { %2879 = shalt.err (!%p2876_p1)
}
  0x29   :  { %s3715_s2 = smov 64   ;;  %s3095_s25 = smov 4  }
  0x2a   :  { %75 = dma.hbm_to_vmem [thread:$0]  %s3700_s5, 256, %s3206_s27, [#allocation9], %s3715_s2, %s3715_s2, %s3095_s25  }
  0x2b   :  { %s3096_s21 = smov [#allocation11]   ;;  %s2880_s26 = scalar_lea.hbm %s3705_s10, 64 }
  0x2c   :  { %s97_s22 = sshll.u32 %s3096_s21, 4  ;;  %p2881_p2 = scmp.ne.s32.totalorder %s3705_s10, %s2880_s26  ;;  %s98_s22 = int_to_ptr.vmem [resolvable:$true] %s97_s22 }
  0x2d   :  { %p2884_p3 = scmp.lt.u32.totalorder %s2880_s26, %s3705_s10 }
  0x2f   :  { %p2886_p4 = pnand %p2884_p3, %p2881_p2 }
  0x31   :  { %2889 = shalt.err (!%p2886_p4)
}
  0x32   :  { %s2890_s18 = scalar_lea.vmem %s98_s22, 64  ;;  %p2895_p6 = scmp.lt.s32.totalorder %s98_s22, %s98_s22 }
  0x33   :  { %p2891_p5 = scmp.ne.s32.totalorder %s98_s22, %s2890_s18  ;;  %p2896_p7 = scmp.lt.s32.totalorder %s2890_s18, %s2890_s18 }
  0x35   :  { %p2897_p8 = por %p2896_p7, %p2895_p6 }
  0x37   :  { %p2898_p9 = pnand %p2897_p8, %p2891_p5 }
  0x39   :  { %2901 = shalt.err (!%p2898_p9)
}
  0x3a   :  { %s3097_s5 = smov 16   ;;  %s3098_s27 = smov 1  }
  0x3b   :  { %103 = dma.hbm_to_vmem [thread:$0]  %s3705_s10, 64, %s98_s22, [#allocation12], %s3097_s5, %s3097_s5, %s3098_s27  }
  0x3c   :  { %s3099_s20 = smov [#allocation14]   ;;  %s3100_s23 = smov [#allocation2]  }
  0x3d   :  { %s121_s21 = sshll.u32 %s3099_s20, 4  ;;  %s38_s24 = sshll.u32 %s3100_s23, 4  ;;  %s122_s21 = int_to_ptr.vmem [resolvable:$true] %s121_s21  ;;  %s39_s24 = int_to_ptr.vmem [resolvable:$true] %s38_s24 }
  0x3e   :  { %s2902_s29 = scalar_lea.hbm %s3707_s12, 64 }
  0x3f   :  { %p2903_p10 = scmp.ne.s32.totalorder %s3707_s12, %s2902_s29  ;;  %p2906_p11 = scmp.lt.u32.totalorder %s2902_s29, %s3707_s12 }
  0x41   :  { %p2908_p12 = pnand %p2906_p11, %p2903_p10 }
  0x43   :  { %2911 = shalt.err (!%p2908_p12)
}
  0x44   :  { %s2912_s10 = scalar_lea.vmem %s122_s21, 64  ;;  %p2917_p0 = scmp.lt.s32.totalorder %s122_s21, %s122_s21 }
  0x45   :  { %p2913_p13 = scmp.ne.s32.totalorder %s122_s21, %s2912_s10  ;;  %p2918_p1 = scmp.lt.s32.totalorder %s2912_s10, %s2912_s10 }
  0x47   :  { %p2919_p2 = por %p2918_p1, %p2917_p0 }
  0x49   :  { %p2920_p3 = pnand %p2919_p2, %p2913_p13 }
  0x4b   :  { %2923 = shalt.err (!%p2920_p3)
}
  0x4c   :  { %127 = dma.hbm_to_vmem [thread:$0]  %s3707_s12, 64, %s122_s21, [#allocation15], %s3097_s5, %s3097_s5, %s3098_s27  }
  0x4d   :  { %s3719_s20 = sld [smem:[#allocation28_spill]] }
  0x53   :  { %s2924_s23 = scalar_lea.hbm %s3719_s20, 64 }
  0x54   :  { %p2925_p4 = scmp.ne.s32.totalorder %s3719_s20, %s2924_s23  ;;  %p2928_p5 = scmp.lt.u32.totalorder %s2924_s23, %s3719_s20 }
  0x56   :  { %p2930_p6 = pnand %p2928_p5, %p2925_p4 }
  0x58   :  { %2933 = shalt.err (!%p2930_p6)
}
  0x59   :  { %s2934_s30 = scalar_lea.vmem %s39_s24, 64  ;;  %p2939_p8 = scmp.lt.s32.totalorder %s39_s24, %s39_s24 }
  0x5a   :  { %p2935_p7 = scmp.ne.s32.totalorder %s39_s24, %s2934_s30  ;;  %p2940_p9 = scmp.lt.s32.totalorder %s2934_s30, %s2934_s30 }
  0x5c   :  { %p2941_p10 = por %p2940_p9, %p2939_p8 }
  0x5e   :  { %p2942_p11 = pnand %p2941_p10, %p2935_p7 }
  0x60   :  { %2945 = shalt.err (!%p2942_p11)
}
  0x61   :  { %41 = dma.hbm_to_vmem [thread:$0]  %s3719_s20, 64, %s39_s24, [#allocation3]  }
  0x62   :  { %s3101_s18 = smov [#allocation7]   ;;  %s3102_s22 = smov [#allocation10]  }
  0x63   :  { %s60_s10 = sshll.u32 %s3101_s18, 4  ;;  %s82_s19 = sshll.u32 %s3102_s22, 4  ;;  %s61_s10 = int_to_ptr.vmem [resolvable:$true] %s60_s10  ;;  %s83_s19 = int_to_ptr.vmem [resolvable:$true] %s82_s19 }
  0x64   :  { %s2946_s23 = scalar_lea.hbm %s3699_s4, 16 }
  0x65   :  { %p2947_p12 = scmp.ne.s32.totalorder %s3699_s4, %s2946_s23  ;;  %p2950_p13 = scmp.lt.u32.totalorder %s2946_s23, %s3699_s4 }
  0x67   :  { %p2952_p0 = pnand %p2950_p13, %p2947_p12 }
  0x69   :  { %2955 = shalt.err (!%p2952_p0)
}
  0x6a   :  { %s2956_s24 = scalar_lea.vmem %s61_s10, 16  ;;  %s2960_s20 = scalar_lea.vmem %s61_s10, 32 }
  0x6b   :  { %p2957_p1 = scmp.ne.s32.totalorder %s61_s10, %s2956_s24  ;;  %p2961_p2 = scmp.lt.s32.totalorder %s61_s10, %s61_s10 }
  0x6c   :  { %p2962_p3 = scmp.lt.s32.totalorder %s2960_s20, %s2956_s24 }
  0x6e   :  { %p2963_p4 = por %p2962_p3, %p2961_p2 }
  0x70   :  { %p2964_p5 = pnand %p2963_p4, %p2957_p1 }
  0x72   :  { %2967 = shalt.err (!%p2964_p5)
}
  0x73   :  { %63 = dma.hbm_to_vmem [thread:$0]  %s3699_s4, 16, %s61_s10, [#allocation6]  }
  0x74   :  { %s2968_s22 = scalar_lea.hbm %s3701_s6, 16 }
  0x75   :  { %p2969_p6 = scmp.ne.s32.totalorder %s3701_s6, %s2968_s22  ;;  %p2972_p7 = scmp.lt.u32.totalorder %s2968_s22, %s3701_s6 }
  0x77   :  { %p2974_p8 = pnand %p2972_p7, %p2969_p6 }
  0x79   :  { %2977 = shalt.err (!%p2974_p8)
}
  0x7a   :  { %s2978_s28 = scalar_lea.vmem %s83_s19, 16  ;;  %s2982_s29 = scalar_lea.vmem %s83_s19, 32 }
  0x7b   :  { %p2979_p9 = scmp.ne.s32.totalorder %s83_s19, %s2978_s28  ;;  %p2983_p10 = scmp.lt.s32.totalorder %s83_s19, %s83_s19 }
  0x7c   :  { %p2984_p11 = scmp.lt.s32.totalorder %s2982_s29, %s2978_s28 }
  0x7e   :  { %p2985_p12 = por %p2984_p11, %p2983_p10 }
  0x80   :  { %p2986_p13 = pnand %p2985_p12, %p2979_p9 }
  0x82   :  { %2989 = shalt.err (!%p2986_p13)
}
  0x83   :  { %85 = dma.hbm_to_vmem [thread:$0]  %s3701_s6, 16, %s83_s19, [#allocation9]  }
  0x84   :  { %s3103_s0 = smov [#allocation13]   ;;  %s3104_s20 = smov [#allocation16]  }
  0x85   :  { %s109_s24 = sshll.u32 %s3103_s0, 4  ;;  %s133_s30 = sshll.u32 %s3104_s20, 4  ;;  %s110_s24 = int_to_ptr.vmem [resolvable:$true] %s109_s24  ;;  %s134_s30 = int_to_ptr.vmem [resolvable:$true] %s133_s30 }
  0x86   :  { %s2990_s18 = scalar_lea.hbm %s3706_s11, 1024 }
  0x87   :  { %p2991_p0 = scmp.ne.s32.totalorder %s3706_s11, %s2990_s18  ;;  %p2994_p1 = scmp.lt.u32.totalorder %s2990_s18, %s3706_s11 }
  0x89   :  { %p2996_p2 = pnand %p2994_p1, %p2991_p0 }
  0x8b   :  { %2999 = shalt.err (!%p2996_p2)
}
  0x8c   :  { %s3000_s6 = scalar_lea.vmem %s110_s24, 1024  ;;  %p3005_p4 = scmp.lt.s32.totalorder %s110_s24, %s110_s24 }
  0x8d   :  { %p3001_p3 = scmp.ne.s32.totalorder %s110_s24, %s3000_s6  ;;  %p3006_p5 = scmp.lt.s32.totalorder %s3000_s6, %s3000_s6 }
  0x8f   :  { %p3007_p6 = por %p3006_p5, %p3005_p4 }
  0x91   :  { %p3008_p7 = pnand %p3007_p6, %p3001_p3 }
  0x93   :  { %3011 = shalt.err (!%p3008_p7)
}
  0x94   :  { %s3720_s19 = smov 64   ;;  %s3012_s10 = scalar_lea.hbm %s3708_s13, 1024 }
  0x95   :  { %115 = dma.hbm_to_vmem [thread:$0]  %s3706_s11, 1024, %s110_s24, [#allocation12], %s3720_s19, %s3720_s19, %s3095_s25  }
  0x96   :  { %p3013_p8 = scmp.ne.s32.totalorder %s3708_s13, %s3012_s10  ;;  %p3016_p9 = scmp.lt.u32.totalorder %s3012_s10, %s3708_s13 }
  0x98   :  { %p3018_p10 = pnand %p3016_p9, %p3013_p8 }
  0x9a   :  { %3021 = shalt.err (!%p3018_p10)
}
  0x9b   :  { %s3022_s18 = scalar_lea.vmem %s134_s30, 1024  ;;  %p3027_p12 = scmp.lt.s32.totalorder %s134_s30, %s134_s30 }
  0x9c   :  { %p3023_p11 = scmp.ne.s32.totalorder %s134_s30, %s3022_s18  ;;  %p3028_p13 = scmp.lt.s32.totalorder %s3022_s18, %s3022_s18 }
  0x9e   :  { %p3029_p0 = por %p3028_p13, %p3027_p12 }
  0xa0   :  { %p3030_p1 = pnand %p3029_p0, %p3023_p11 }
  0xa2   :  { %3033 = shalt.err (!%p3030_p1)
}
  0xa3   :  { %139 = dma.hbm_to_vmem [thread:$0]  %s3708_s13, 1024, %s134_s30, [#allocation15], %s3720_s19, %s3720_s19, %s3095_s25  }
  0xa4   :  { %3078 = dma.done.wait [#allocation3], 64  }
  0xa5   :  { %3079 = vsyncadd [#allocation3], 4294967232 }
  0xa6   :  { %3080 = dma.done.wait [#allocation6], 32  }
  0xa7   :  { %3081 = vsyncadd [#allocation6], 4294967264 }
  0xa8   :  { %3082 = dma.done.wait [#allocation9], 272  }
  0xa9   :  { %3083 = vsyncadd [#allocation9], 4294967024 }
  0xaa   :  { %3084 = dma.done.wait [#allocation12], 1088  }
  0xab   :  { %3085 = vsyncadd [#allocation12], 4294966208 }
  0xac   :  { %3086 = dma.done.wait [#allocation15], 1088  }
  0xad   :  { %3087 = vsyncadd [#allocation15], 4294966208  ;;  %v3105_v0 = vmov 0   ;;  %s3721_s2 = sld [smem:[#allocation27_spill]]  ;;  %v3106_v5 = vmov 1   ;;  %v2792_v6 = vld [vmem:[%s3698_s3] sm:$0xff]  }
  0xae   :  { %2787 = vset.pattern.permute.xlu1 %v3105_v0  ;;  %2786 = vset.pattern.permute.xlu0 %v3105_v0  ;;  %v3107_v7 = vmov 2   ;;  %v2793_v8 = vld [vmem:[%s3698_s3 + $0x8] sm:$0xff]   ;;  %v2794_v9 = vld [vmem:[%s3698_s3 + $0x10] sm:$0xff]   ;;  %v2795_v10 = vld [vmem:[%s3698_s3 + $0x18] sm:$0xff]   ;;  %vm312_vm0 = vcmask 523264   ;;  %vm401_vm1 = vcmask 261120  }
  0xaf   :  { %2538 = vmatprep.subr.bf16.mxu0 %v2792_v6  ;;  %v2341_v17 = vld [vmem:[#allocation2] ss:$0 sm:$0xff]  ;;  %v2343_v20 = vld [vmem:[#allocation2 + $0x1] ss:$0 sm:$0xff]  ;;  %v2342_v23 = vld [vmem:[#allocation5] ss:$0 sm:$0xff] }
  0xb0   :  { %2539 = vmatpush3.bf16.msra.mxu0 %v2792_v6  ;;  %v2344_v28 = vld [vmem:[#allocation2 + $0x2] ss:$0 sm:$0xff]  ;;  %v2796_v59 = vld [vmem:[#allocation8] sm:$0xff]   ;;  %v2797_v60 = vld [vmem:[#allocation8 + $0x8] sm:$0xff]   ;;  %vm3109_vm2 = vmmov 0   ;;  %vm588_vm3 = vcmask 1043459  }
  0xb1   :  { %2540 = vmatprep.subr.bf16.mxu0 %v2793_v8  ;;  %2550 = vmatprep.subr.bf16.mxu1 %v2796_v59  ;;  %v2798_v61 = vld [vmem:[%s3702_s7] sm:$0xff]   ;;  %v2351_v62 = vld [vmem:[#allocation7] ss:$0 sm:$0xff]  ;;  %vm583_vm4 = vcmask 1041409   ;;  %vm591_vm5 = vcmask 1041408   ;;  %s3111_s28 = smov 96  }
  0xb2   :  { %2551 = vmatpush3.bf16.msra.mxu1 %v2796_v59 }
  0xb3   :  { %v174_v1 = vld [vmem:[%s3721_s2 + $0x10] sm:$0xff]  ;;  %v172_v2 = vld [vmem:[%s3721_s2] sm:$0xff]  ;;  %v175_v3 = vld [vmem:[%s3721_s2 + $0x18] sm:$0xff]  ;;  %2552 = vmatprep.subr.bf16.mxu1 %v2797_v60 }
  0xb4   :  { %189 = vperm.xlu1 %2787, %v174_v1   ;;  %179 = vperm.xlu0 %2786, %v172_v2   ;;  %v173_v4 = vld [vmem:[%s3721_s2 + $0x8] sm:$0xff] }
  0xb5   :  { %2541 = vmatpush3.bf16.msra.mxu0 %v2793_v8 }
  0xb6   :  { %2542 = vmatprep.subr.bf16.mxu0 %v2794_v9  ;;  %2553 = vmatpush3.bf16.msra.mxu1 %v2797_v60 }
  0xb7   :  { %2558 = vmatprep.subr.bf16.mxu1 %v2798_v61 }
  0xb8   :  { %194 = vperm.xlu1 %2787, %v175_v3   ;;  %184 = vperm.xlu0 %2786, %v173_v4  }
  0xb9   :  { %2543 = vmatpush3.bf16.msra.mxu0 %v2794_v9 }
  0xba   :  { %2544 = vmatprep.subr.bf16.mxu0 %v2795_v10 }
  0xbc   :  { %2789 = vset.pattern.permute.xlu1 %v3106_v5  ;;  %2788 = vset.pattern.permute.xlu0 %v3106_v5 }
  0xbd   :  { %222 = vperm.xlu1 %2789, %v173_v4   ;;  %218 = vperm.xlu0 %2788, %v172_v2  }
  0xbe   :  { %2545 = vmatpush3.bf16.msra.mxu0 %v2795_v10 }
  0xc1   :  { %226 = vperm.xlu1 %2789, %v174_v1   ;;  %230 = vperm.xlu0 %2788, %v175_v3  }
  0xc5   :  { %2790 = vset.pattern.permute.xlu1 %v3107_v7  ;;  %2791 = vset.pattern.permute.xlu0 %v3107_v7 }
  0xc6   :  { %247 = vperm.xlu1 %2790, %v172_v2   ;;  %251 = vperm.xlu0 %2791, %v173_v4  }
  0xca   :  { %255 = vperm.xlu1 %2790, %v174_v1  }
  0xce   :  { %259 = vperm.xlu1 %2790, %v175_v3  }
 0x133   :  { %v190_v11 = vpop.permute.xlu1 %189  ;;  %v180_v12 = vpop.permute.xlu0 %179 }
 0x134   :  { %v201_v18 = vmul.f32 %v2341_v17, %v180_v12  ;;  %v203_v29 = vmul.f32 %v2341_v17, %v190_v11 }
 0x136   :  { %v212_v24 = vadd.f32 %v2342_v23, %v201_v18  ;;  %v214_v40 = vadd.f32 %v2342_v23, %v203_v29  ;;  %v2803_v18 = vld [vmem:[%s3704_s9 + $0x8] sm:$0xff]  }
 0x137   :  { %v195_v13 = vpop.permute.xlu1 %194  ;;  %v185_v14 = vpop.permute.xlu0 %184 }
 0x138   :  { %v202_v19 = vmul.f32 %v2341_v17, %v185_v14  ;;  %v204_v36 = vmul.f32 %v2341_v17, %v195_v13  ;;  %v2799_v13 = vld [vmem:[%s3702_s7 + $0x8] sm:$0xff]   ;;  %v2800_v14 = vld [vmem:[%s3702_s7 + $0x10] sm:$0xff]   ;;  %v3108_v17 = vmov 0.0  }
 0x139   :  { %2570 = vmatprep.subr.bf16.mxu0 %v3108_v17 }
 0x13a   :  { %v213_v25 = vadd.f32 %v2342_v23, %v202_v19  ;;  %v215_v47 = vadd.f32 %v2342_v23, %v204_v36  ;;  %v2804_v19 = vld [vmem:[%s3703_s8] sm:$0xff]  }
 0x13c   :  { %v223_v15 = vpop.permute.xlu1 %222  ;;  %v219_v16 = vpop.permute.xlu0 %218 }
 0x13d   :  { %v238_v26 = vmul.f32 %v2343_v20, %v223_v15  ;;  %v237_v27 = vmul.f32 %v2343_v20, %v219_v16  ;;  %v2801_v15 = vld [vmem:[%s3702_s7 + $0x18] sm:$0xff]   ;;  %v2802_v16 = vld [vmem:[%s3704_s9] sm:$0xff]  }
 0x13f   :  { %v242_v32 = vadd.f32 %v238_v26, %v213_v25  ;;  %v241_v33 = vadd.f32 %v237_v27, %v212_v24 }
 0x140   :  { %v227_v21 = vpop.permute.xlu1 %226  ;;  %v231_v22 = vpop.permute.xlu0 %230 }
 0x141   :  { %v239_v37 = vmul.f32 %v2343_v20, %v227_v21  ;;  %v240_v41 = vmul.f32 %v2343_v20, %v231_v22  ;;  %v2356_v20 = vld [vmem:[#allocation10] ss:$0 sm:$0xff] }
 0x143   :  { %v243_v48 = vadd.f32 %v239_v37, %v214_v40  ;;  %v244_v51 = vadd.f32 %v240_v41, %v215_v47 }
 0x145   :  { %v248_v30 = vpop.permute.xlu1 %247  ;;  %v252_v31 = vpop.permute.xlu0 %251 }
 0x146   :  { %v266_v34 = vmul.f32 %v2344_v28, %v248_v30  ;;  %v267_v35 = vmul.f32 %v2344_v28, %v252_v31 }
 0x148   :  { %v270_v38 = vadd.f32 %v266_v34, %v241_v33  ;;  %v271_v39 = vadd.f32 %v267_v35, %v242_v32 }
 0x149   :  { %v256_v42 = vpop.permute.xlu1 %255 }
 0x14a   :  { %v476_v43 = vpack.c.bf16 %v271_v39, %v270_v38  ;;  %v268_v44 = vmul.f32 %v2344_v28, %v256_v42  ;;  %v274_v45 = vmax.f32 %v270_v38, 0.0  ;;  %v275_v46 = vmax.f32 %v271_v39, 0.0 }
 0x14c   :  { %v286_v49 = vpack.c.bf16 %v275_v46, %v274_v45  ;;  %v272_v52 = vadd.f32 %v268_v44, %v243_v48 }
 0x14d   :  { %v260_v50 = vpop.permute.xlu1 %259 }
 0x14e   :  { %v269_v53 = vmul.f32 %v2344_v28, %v260_v50  ;;  %2546 = vmatprep.mubr.msk.bf16.mxu0 %vm312_vm0, %v286_v49  ;;  %v276_v55 = vmax.f32 %v272_v52, 0.0 }
 0x150   :  { %v273_v54 = vadd.f32 %v269_v53, %v244_v51 }
 0x152   :  { %v277_v56 = vmax.f32 %v273_v54, 0.0  ;;  %v477_v57 = vpack.c.bf16 %v273_v54, %v272_v52 }
 0x154   :  { %v287_v58 = vpack.c.bf16 %v277_v56, %v276_v55 }
 0x156   :  { %2547 = vmatmul.mubr.msk.bf16.vlgmr.msra.gmra.mrb[0].mxu0 %vm312_vm0, %v287_v58 }
 0x157   :  { %2571 = vmatpush3.bf16.msra.mxu0 %v2802_v16  ;;  %2574 = vmatprep.mubr.msk.bf16.mxu0 %vm3109_vm2, %v3108_v17 }
 0x158   :  { %2572 = vmatprep.subr.bf16.mxu0 %v3108_v17 }
 0x15b   :  { %2573 = vmatpush3.bf16.msra.mxu0 %v2803_v18 }
 0x15c   :  { %2578 = vmatprep.subr.bf16.mxu0 %v2804_v19 }
 0x229   :  { %v2548_v63 = vpop.f32.mrb[0].mxu0 }
 0x22a   :  { %v377_v0 = vadd.f32 %v2548_v63, %v2351_v62  ;;  %v353_v1 = vpop.f32.mrb[1].mxu0  ;;  %v2807_v63 = vld [vmem:[#allocation13 + $0x8] sm:$0xff]  }
 0x22b   :  { %v375_v2 = vadd.f32 %v2351_v62, %v353_v1  ;;  %v2549_v3 = vpop.f32.mrb[2].mxu0  ;;  %v3110_v1 = vmov 1966171168  }
 0x22c   :  { %v378_v4 = vadd.f32 %v2549_v3, %v2351_v62  ;;  %v356_v5 = vpop.f32.mrb[3].mxu0  ;;  %v381_v7 = vmax.f32 %v377_v0, 0.0  ;;  %v2808_v0 = vld [vmem:[#allocation16] sm:$0xff]   ;;  %v657_v3 = vlaneseq }
 0x22d   :  { %v376_v6 = vadd.f32 %v2351_v62, %v356_v5  ;;  %v379_v9 = vmax.f32 %v375_v2, 0.0  ;;  %v2806_v62 = vld [vmem:[#allocation13] sm:$0xff]   ;;  %v655_v2 = vunpack.c.l.s4 %v3110_v1 }
 0x22e   :  { %v382_v8 = vmax.f32 %v378_v4, 0.0  ;;  %v658_v5 = vshrl.u32 %v657_v3, 7 }
 0x22f   :  { %v380_v10 = vmax.f32 %v376_v6, 0.0  ;;  %v656_v4 = vunpack.c.0.s8 %v655_v2 }
 0x230   :  { %v388_v11 = vpack.c.bf16 %v382_v8, %v381_v7 }
 0x231   :  { %v387_v12 = vpack.c.bf16 %v380_v10, %v379_v9  ;;  %v3427_v6 = vsub.s32 %v656_v4, %v658_v5 }
 0x233   :  { %2554 = vmatprep.mubr.msk.bf16.mxu1 %vm401_vm1, %v387_v12 }
 0x234   :  { %2555 = vmatmul.mubr.msk.bf16.vlgmr.msra.gmra.mrb[0].mxu1 %vm401_vm1, %v388_v11 }
 0x235   :  { %2559 = vmatpush3.bf16.msra.mxu1 %v2798_v61  ;;  %2566 = vmatprep.mubr.msk.bf16.mxu1 %vm312_vm0, %v476_v43  ;;  %v2805_v61 = vld [vmem:[%s3703_s8 + $0x8] sm:$0xff]  }
 0x236   :  { %2560 = vmatprep.subr.bf16.mxu1 %v2799_v13 }
 0x239   :  { %2561 = vmatpush3.bf16.msra.mxu1 %v2799_v13 }
 0x23a   :  { %2562 = vmatprep.subr.bf16.mxu1 %v2800_v14 }
 0x23d   :  { %2563 = vmatpush3.bf16.msra.mxu1 %v2800_v14  ;;  %v3431_v14 = vsub.s32 0, %v658_v5 }
 0x23e   :  { %2564 = vmatprep.subr.bf16.mxu1 %v2801_v15 }
 0x241   :  { %2565 = vmatpush3.bf16.msra.mxu1 %v2801_v15 }
 0x242   :  { %2586 = vmatprep.subr.bf16.mxu1 %v2806_v62 }
 0x244   :  { %2567 = vmatmul.mubr.msk.bf16.vlgmr.msra.gmra.mrb[0].mxu1 %vm312_vm0, %v477_v57 }
 0x245   :  { %2587 = vmatpush3.bf16.msra.mxu1 %v2806_v62 }
 0x246   :  { %2588 = vmatprep.subr.bf16.mxu1 %v2807_v63 }
 0x249   :  { %2589 = vmatpush3.bf16.msra.mxu1 %v2807_v63 }
 0x24a   :  { %2594 = vmatprep.subr.bf16.mxu1 %v2808_v0 }
 0x317   :  { %v2568_v21 = vpop.f32.mrb[0].mxu1 }
 0x318   :  { %v3391_v22 = vadd.f32 %v2568_v21, %v2356_v20  ;;  %v542_v23 = vpop.f32.mrb[1].mxu1 }
 0x319   :  { %v3393_v24 = vadd.f32 %v2356_v20, %v542_v23  ;;  %v2569_v25 = vpop.f32.mrb[2].mxu1  ;;  %v2370_v23 = vld [vmem:[#allocation11] ss:$0 sm:$0xff] }
 0x31a   :  { %v3395_v26 = vadd.f32 %v2569_v25, %v2356_v20  ;;  %v545_v27 = vpop.f32.mrb[3].mxu1  ;;  %v570_v28 = vsel %vm401_vm1, %v3391_v22, -inf  ;;  %v680_v29 = vmax.f32 %v3391_v22, 0.0 }
 0x31b   :  { %v561_v30 = vsel %vm401_vm1, %v3393_v24, -inf  ;;  %v3402_v31 = vadd.f32 %v2356_v20, %v545_v27  ;;  %v678_v32 = vmax.f32 %v3393_v24, 0.0 }
 0x31c   :  { %v571_v33 = vsel %vm401_vm1, %v3395_v26, -inf  ;;  %v681_v34 = vmax.f32 %v3395_v26, 0.0  ;;  %v873_v35 = vpack.c.bf16 %v3395_v26, %v3391_v22  ;;  %v2375_v22 = vld [vmem:[#allocation14] ss:$0 sm:$0xff] }
 0x31d   :  { %v572_v36 = vmax.f32 %v570_v28, %v571_v33  ;;  %v562_v37 = vsel %vm401_vm1, %v3402_v31, -inf  ;;  %v679_v38 = vmax.f32 %v3402_v31, 0.0  ;;  %v872_v39 = vpack.c.bf16 %v3402_v31, %v3393_v24  ;;  %v2811_v24 = vld [vmem:[%s3704_s9 + $0x18] sm:$0xff]   ;;  %v2812_v31 = vld [vmem:[%s3703_s8 + $0x10] sm:$0xff]  }
 0x31e   :  { %v687_v40 = vpack.c.bf16 %v681_v34, %v680_v29  ;;  %v563_v41 = vmax.f32 %v561_v30, %v562_v37 }
 0x31f   :  { %v573_v42 = vrot.slane %v572_v36, 4  ;;  %v686_v43 = vpack.c.bf16 %v679_v38, %v678_v32 }
 0x320   :  { %v564_v44 = vrot.slane %v563_v41, 4 }
 0x321   :  { %v574_v45 = vmax.f32 %v572_v36, %v573_v42 }
 0x322   :  { %v565_v46 = vmax.f32 %v563_v41, %v564_v44 }
 0x323   :  { %v575_v47 = vrot.slane %v574_v45, 2 }
 0x324   :  { %v566_v48 = vrot.slane %v565_v46, 2 }
 0x325   :  { %v576_v49 = vmax.f32 %v574_v45, %v575_v47 }
 0x326   :  { %v567_v50 = vmax.f32 %v565_v46, %v566_v48  ;;  %v2809_v48 = vld [vmem:[#allocation16 + $0x8] sm:$0xff]  }
 0x327   :  { %v577_v51 = vrot.slane %v576_v49, 1 }
 0x328   :  { %v568_v52 = vrot.slane %v567_v50, 1 }
 0x329   :  { %v578_v53 = vmax.f32 %v576_v49, %v577_v51  ;;  %v2810_v49 = vld [vmem:[%s3704_s9 + $0x10] sm:$0xff]  }
 0x32a   :  { %v569_v54 = vmax.f32 %v567_v50, %v568_v52 }
 0x32b   :  { %v580_v55 = vmax.f32 %v578_v53, 0.0 }
 0x32c   :  { %v579_v56 = vmax.f32 %v569_v54, 0.0  ;;  %v589_v57 = vsel %vm588_vm3, %v578_v53, %v569_v54 }
 0x32e   :  { %v584_v58 = vsel %vm583_vm4, %v580_v55, %v579_v56 }
 0x32f   :  { %v592_v59 = vsel %vm591_vm5, %v584_v58, %v589_v57 }
 0x330   :  { %v593_v60 = vpack.c.bf16 %v592_v59, %v592_v59 }
 0x332   :  { %2575 = vmatmul.mubr.msk.bf16.vlgmr.msra.gmra.mrb[4].mxu0 %vm401_vm1, %v593_v60 }
 0x333   :  { %2579 = vmatpush3.bf16.msra.mxu0 %v2804_v19  ;;  %2582 = vmatprep.mubr.msk.bf16.mxu0 %vm401_vm1, %v686_v43 }
 0x334   :  { %2580 = vmatprep.subr.bf16.mxu0 %v2805_v61 }
 0x337   :  { %2581 = vmatpush3.bf16.msra.mxu0 %v2805_v61 }
 0x338   :  { %2602 = vmatprep.subr.bf16.mxu0 %v3108_v17 }
 0x33a   :  { %2583 = vmatmul.mubr.msk.bf16.vlgmr.msra.gmra.mrb[8].mxu0 %vm401_vm1, %v687_v40 }
 0x33b   :  { %2606 = vmatprep.mubr.msk.bf16.mxu0 %vm3109_vm2, %v3108_v17  ;;  %2603 = vmatpush3.bf16.msra.mxu0 %v2810_v49 }
 0x33c   :  { %2604 = vmatprep.subr.bf16.mxu0 %v3108_v17 }
 0x33f   :  { %2605 = vmatpush3.bf16.msra.mxu0 %v2811_v24 }
 0x340   :  { %2610 = vmatprep.subr.bf16.mxu0 %v2812_v31 }
 0x405   :  { %v647_v7 = vpop.f32.mrb[4].mxu0 }
 0x406   :  { %v660_v8 = vrot.slane %v647_v7, %v3427_v6  ;;  %v2576_v9 = vpop.f32.mrb[5].mxu0 }
 0x407   :  { %v650_v10 = vpop.f32.mrb[6].mxu0 }
 0x408   :  { %v661_v11 = vcombine.high %v660_v8, %v660_v8  ;;  %v668_v12 = vrot.slane %v660_v8, %v3427_v6  ;;  %v2577_v13 = vpop.f32.mrb[7].mxu0 }
 0x40a   :  { %v676_v15 = vcombine.high %v668_v12, %v668_v12  ;;  %v675_v16 = vrot.slane %v661_v11, %v3427_v6  ;;  %v758_v25 = vrot.slane %v668_v12, %v3431_v14 }
 0x40c   :  { %v762_v18 = vrot.slane %v675_v16, %v3431_v14  ;;  %v944_v19 = vrot.slane %v676_v15, %v3431_v14  ;;  %v677_v20 = vcombine.high %v675_v16, %v675_v16 }
 0x40d   :  { %v2584_v21 = vpop.f32.mrb[8].mxu0 }
 0x40e   :  { %v767_v27 = vadd.f32 %v2584_v21, %v762_v18  ;;  %949 = vrot.lane.b32.xlu0 %v944_v19, %s3111_s28  ;;  %v740_v28 = vpop.f32.mrb[9].mxu0  ;;  %v948_v29 = vrot.slane %v677_v20, %v3431_v14 }
 0x40f   :  { %v765_v30 = vadd.f32 %v758_v25, %v740_v28  ;;  %v2585_v32 = vpop.f32.mrb[10].mxu0 }
 0x410   :  { %v778_v33 = vadd.f32 %v2370_v23, %v767_v27  ;;  %v768_v34 = vadd.f32 %v2585_v32, %v762_v18  ;;  %951 = vrot.lane.b32.xlu1 %v948_v29, %s3111_s28  ;;  %v743_v36 = vpop.f32.mrb[11].mxu0 }
 0x411   :  { %v776_v37 = vadd.f32 %v2370_v23, %v765_v30  ;;  %v766_v38 = vadd.f32 %v758_v25, %v743_v36 }
 0x412   :  { %v779_v40 = vadd.f32 %v2370_v23, %v768_v34  ;;  %v782_v42 = vmax.f32 %v778_v33, 0.0 }
 0x413   :  { %v777_v41 = vadd.f32 %v2370_v23, %v766_v38  ;;  %v780_v44 = vmax.f32 %v776_v37, 0.0  ;;  %v2813_v37 = vld [vmem:[%s3703_s8 + $0x18] sm:$0xff]  }
 0x414   :  { %v783_v43 = vmax.f32 %v779_v40, 0.0  ;;  %v2814_v38 = vld [vmem:[#allocation13 + $0x10] sm:$0xff]   ;;  %v2815_v40 = vld [vmem:[#allocation13 + $0x18] sm:$0xff]  }
 0x415   :  { %v781_v45 = vmax.f32 %v777_v41, 0.0  ;;  %v2816_v41 = vld [vmem:[#allocation16 + $0x10] sm:$0xff]  }
 0x416   :  { %v789_v46 = vpack.c.bf16 %v783_v43, %v782_v42 }
 0x417   :  { %v788_v47 = vpack.c.bf16 %v781_v45, %v780_v44 }
 0x419   :  { %2590 = vmatprep.mubr.msk.bf16.mxu1 %vm401_vm1, %v788_v47 }
 0x41a   :  { %2591 = vmatmul.mubr.msk.bf16.vlgmr.msra.gmra.mrb[4].mxu1 %vm401_vm1, %v789_v46 }
 0x41b   :  { %2595 = vmatpush3.bf16.msra.mxu1 %v2808_v0  ;;  %2598 = vmatprep.mubr.msk.bf16.mxu1 %vm401_vm1, %v872_v39 }
 0x41c   :  { %2596 = vmatprep.subr.bf16.mxu1 %v2809_v48 }
 0x41f   :  { %2597 = vmatpush3.bf16.msra.mxu1 %v2809_v48 }
 0x420   :  { %2618 = vmatprep.subr.bf16.mxu1 %v2814_v38 }
 0x426   :  { %2599 = vmatmul.mubr.msk.bf16.vlgmr.msra.gmra.mrb[4].mxu1 %vm401_vm1, %v873_v35 }
 0x427   :  { %2619 = vmatpush3.bf16.msra.mxu1 %v2814_v38 }
 0x428   :  { %2620 = vmatprep.subr.bf16.mxu1 %v2815_v40 }
 0x42b   :  { %2621 = vmatpush3.bf16.msra.mxu1 %v2815_v40 }
 0x42c   :  { %2626 = vmatprep.subr.bf16.mxu1 %v2816_v41 }
 0x480   :  { %v950_v53 = vpop.permute.xlu0 %949 }
 0x482   :  { %v952_v50 = vpop.permute.xlu1 %951 }
 0x4f9   :  { %v2600_v26 = vpop.f32.mrb[4].mxu1 }
 0x4fa   :  { %v2710_v35 = vadd.f32 %v2600_v26, %v2375_v22  ;;  %v926_v39 = vpop.f32.mrb[5].mxu1 }
 0x4fb   :  { %v2712_v51 = vadd.f32 %v2375_v22, %v926_v39  ;;  %v2601_v52 = vpop.f32.mrb[6].mxu1  ;;  %v2395_v39 = vld [vmem:[#allocation11 + $0x1] ss:$0 sm:$0xff] }
 0x4fc   :  { %v3460_v54 = vadd.f32 %v2710_v35, %v952_v50  ;;  %v2714_v55 = vadd.f32 %v2601_v52, %v2375_v22  ;;  %v929_v56 = vpop.f32.mrb[7].mxu1 }
 0x4fd   :  { %v3462_v57 = vadd.f32 %v2712_v51, %v950_v53  ;;  %v2716_v58 = vadd.f32 %v2375_v22, %v929_v56 }
 0x4fe   :  { %v3464_v59 = vadd.f32 %v2714_v55, %v952_v50  ;;  %v972_v60 = vsel %vm401_vm1, %v3460_v54, -inf  ;;  %v1080_v61 = vmax.f32 %v3460_v54, 0.0 }
 0x4ff   :  { %v963_v62 = vsel %vm401_vm1, %v3462_v57, -inf  ;;  %v3471_v63 = vadd.f32 %v2716_v58, %v950_v53  ;;  %v1078_v0 = vmax.f32 %v3462_v57, 0.0 }
 0x500   :  { %v973_v1 = vsel %vm401_vm1, %v3464_v59, -inf  ;;  %v1081_v2 = vmax.f32 %v3464_v59, 0.0  ;;  %v1278_v3 = vpack.c.bf16 %v3464_v59, %v3460_v54  ;;  %v2400_v54 = vld [vmem:[#allocation14 + $0x1] ss:$0 sm:$0xff] }
 0x501   :  { %v974_v4 = vmax.f32 %v972_v60, %v973_v1  ;;  %v964_v5 = vsel %vm401_vm1, %v3471_v63, -inf  ;;  %v1079_v7 = vmax.f32 %v3471_v63, 0.0  ;;  %v1277_v8 = vpack.c.bf16 %v3471_v63, %v3462_v57  ;;  %v2819_v57 = vld [vmem:[%s3704_s9 + $0x28] sm:$0xff]   ;;  %v2820_v63 = vld [vmem:[%s3703_s8 + $0x20] sm:$0xff]  }
 0x502   :  { %v1088_v9 = vpack.c.bf16 %v1081_v2, %v1080_v61  ;;  %v965_v10 = vmax.f32 %v963_v62, %v964_v5 }
 0x503   :  { %v975_v11 = vrot.slane %v974_v4, 4  ;;  %v1087_v12 = vpack.c.bf16 %v1079_v7, %v1078_v0 }
 0x504   :  { %v966_v13 = vrot.slane %v965_v10, 4 }
 0x505   :  { %v976_v15 = vmax.f32 %v974_v4, %v975_v11 }
 0x506   :  { %v967_v16 = vmax.f32 %v965_v10, %v966_v13  ;;  %v2818_v13 = vld [vmem:[%s3704_s9 + $0x20] sm:$0xff]  }
 0x507   :  { %v977_v18 = vrot.slane %v976_v15, 2 }
 0x508   :  { %v968_v19 = vrot.slane %v967_v16, 2 }
 0x509   :  { %v978_v20 = vmax.f32 %v976_v15, %v977_v18 }
 0x50a   :  { %v969_v21 = vmax.f32 %v967_v16, %v968_v19 }
 0x50b   :  { %v979_v23 = vrot.slane %v978_v20, 1 }
 0x50c   :  { %v970_v25 = vrot.slane %v969_v21, 1 }
 0x50d   :  { %v980_v27 = vmax.f32 %v978_v20, %v979_v23 }
 0x50e   :  { %v971_v28 = vmax.f32 %v969_v21, %v970_v25 }
 0x50f   :  { %v982_v29 = vmax.f32 %v980_v27, 0.0 }
 0x510   :  { %v981_v30 = vmax.f32 %v971_v28, 0.0  ;;  %v989_v32 = vsel %vm588_vm3, %v980_v27, %v971_v28 }
 0x512   :  { %v985_v33 = vsel %vm583_vm4, %v982_v29, %v981_v30 }
 0x513   :  { %v991_v34 = vsel %vm591_vm5, %v985_v33, %v989_v32 }
 0x514   :  { %v992_v36 = vpack.c.bf16 %v991_v34, %v991_v34 }
 0x516   :  { %2607 = vmatmul.mubr.msk.bf16.vlgmr.msra.gmra.mrb[12].mxu0 %vm401_vm1, %v992_v36 }
 0x517   :  { %2611 = vmatpush3.bf16.msra.mxu0 %v2812_v31  ;;  %2614 = vmatprep.mubr.msk.bf16.mxu0 %vm401_vm1, %v1087_v12  ;;  %v2817_v12 = vld [vmem:[#allocation16 + $0x18] sm:$0xff]  }
 0x518   :  { %2612 = vmatprep.subr.bf16.mxu0 %v2813_v37 }
 0x51b   :  { %2613 = vmatpush3.bf16.msra.mxu0 %v2813_v37 }
 0x51c   :  { %2634 = vmatprep.subr.bf16.mxu0 %v3108_v17 }
 0x51e   :  { %2615 = vmatmul.mubr.msk.bf16.vlgmr.msra.gmra.mrb[16].mxu0 %vm401_vm1, %v1088_v9 }
 0x51f   :  { %2638 = vmatprep.mubr.msk.bf16.mxu0 %vm3109_vm2, %v3108_v17  ;;  %2635 = vmatpush3.bf16.msra.mxu0 %v2818_v13 }
 0x520   :  { %2636 = vmatprep.subr.bf16.mxu0 %v3108_v17 }
 0x523   :  { %2637 = vmatpush3.bf16.msra.mxu0 %v2819_v57 }
 0x524   :  { %2642 = vmatprep.subr.bf16.mxu0 %v2820_v63 }
 0x5e9   :  { %v1047_v42 = vpop.f32.mrb[12].mxu0 }
 0x5ea   :  { %v1060_v43 = vrot.slane %v1047_v42, %v3427_v6  ;;  %v2608_v44 = vpop.f32.mrb[13].mxu0 }
 0x5eb   :  { %v1050_v45 = vpop.f32.mrb[14].mxu0 }
 0x5ec   :  { %v1061_v46 = vcombine.high %v1060_v43, %v1060_v43  ;;  %v1068_v47 = vrot.slane %v1060_v43, %v3427_v6  ;;  %v2609_v48 = vpop.f32.mrb[15].mxu0 }
 0x5ee   :  { %v1076_v49 = vcombine.high %v1068_v47, %v1068_v47  ;;  %v1075_v24 = vrot.slane %v1061_v46, %v3427_v6  ;;  %v1159_v50 = vrot.slane %v1068_v47, %v3431_v14 }
 0x5f0   :  { %v1163_v31 = vrot.slane %v1075_v24, %v3431_v14  ;;  %v1349_v22 = vrot.slane %v1076_v49, %v3431_v14  ;;  %v1077_v26 = vcombine.high %v1075_v24, %v1075_v24 }
 0x5f1   :  { %v2616_v35 = vpop.f32.mrb[16].mxu0 }
 0x5f2   :  { %v1168_v51 = vadd.f32 %v2616_v35, %v1163_v31  ;;  %1354 = vrot.lane.b32.xlu0 %v1349_v22, %s3111_s28  ;;  %v1141_v52 = vpop.f32.mrb[17].mxu0  ;;  %v1353_v53 = vrot.slane %v1077_v26, %v3431_v14 }
 0x5f3   :  { %v1166_v55 = vadd.f32 %v1159_v50, %v1141_v52  ;;  %v2617_v56 = vpop.f32.mrb[18].mxu0 }
 0x5f4   :  { %v1180_v58 = vadd.f32 %v2395_v39, %v1168_v51  ;;  %v1169_v60 = vadd.f32 %v2617_v56, %v1163_v31  ;;  %1356 = vrot.lane.b32.xlu1 %v1353_v53, %s3111_s28  ;;  %v1144_v61 = vpop.f32.mrb[19].mxu0 }
 0x5f5   :  { %v1178_v62 = vadd.f32 %v2395_v39, %v1166_v55  ;;  %v1167_v0 = vadd.f32 %v1159_v50, %v1144_v61 }
 0x5f6   :  { %v1181_v1 = vadd.f32 %v2395_v39, %v1169_v60  ;;  %v1184_v4 = vmax.f32 %v1180_v58, 0.0 }
 0x5f7   :  { %v1179_v2 = vadd.f32 %v2395_v39, %v1167_v0  ;;  %v1182_v7 = vmax.f32 %v1178_v62, 0.0  ;;  %v2821_v62 = vld [vmem:[%s3703_s8 + $0x28] sm:$0xff]  }
 0x5f8   :  { %v1185_v5 = vmax.f32 %v1181_v1, 0.0  ;;  %v2822_v0 = vld [vmem:[#allocation13 + $0x20] sm:$0xff]   ;;  %v2823_v1 = vld [vmem:[#allocation13 + $0x28] sm:$0xff]  }
 0x5f9   :  { %v1183_v9 = vmax.f32 %v1179_v2, 0.0  ;;  %v2824_v2 = vld [vmem:[#allocation16 + $0x20] sm:$0xff]  }
 0x5fa   :  { %v1192_v10 = vpack.c.bf16 %v1185_v5, %v1184_v4 }
 0x5fb   :  { %v1191_v11 = vpack.c.bf16 %v1183_v9, %v1182_v7 }
 0x5fd   :  { %2622 = vmatprep.mubr.msk.bf16.mxu1 %vm401_vm1, %v1191_v11 }
 0x5fe   :  { %2623 = vmatmul.mubr.msk.bf16.vlgmr.msra.gmra.mrb[8].mxu1 %vm401_vm1, %v1192_v10 }
 0x5ff   :  { %2627 = vmatpush3.bf16.msra.mxu1 %v2816_v41  ;;  %2630 = vmatprep.mubr.msk.bf16.mxu1 %vm401_vm1, %v1277_v8 }
 0x600   :  { %2628 = vmatprep.subr.bf16.mxu1 %v2817_v12 }
 0x603   :  { %2629 = vmatpush3.bf16.msra.mxu1 %v2817_v12 }
 0x604   :  { %2650 = vmatprep.subr.bf16.mxu1 %v2822_v0 }
 0x60a   :  { %2631 = vmatmul.mubr.msk.bf16.vlgmr.msra.gmra.mrb[8].mxu1 %vm401_vm1, %v1278_v3 }
 0x60b   :  { %2651 = vmatpush3.bf16.msra.mxu1 %v2822_v0 }
 0x60c   :  { %2652 = vmatprep.subr.bf16.mxu1 %v2823_v1 }
 0x60f   :  { %2653 = vmatpush3.bf16.msra.mxu1 %v2823_v1 }
 0x610   :  { %2658 = vmatprep.subr.bf16.mxu1 %v2824_v2 }
 0x664   :  { %v1355_v19 = vpop.permute.xlu0 %1354 }
 0x666   :  { %v1357_v15 = vpop.permute.xlu1 %1356 }
 0x6dd   :  { %v2632_v59 = vpop.f32.mrb[8].mxu1 }
 0x6de   :  { %v2718_v3 = vadd.f32 %v2632_v59, %v2400_v54  ;;  %v1331_v8 = vpop.f32.mrb[9].mxu1 }
 0x6df   :  { %v2720_v16 = vadd.f32 %v2400_v54, %v1331_v8  ;;  %v2633_v18 = vpop.f32.mrb[10].mxu1  ;;  %v2420_v8 = vld [vmem:[#allocation11 + $0x2] ss:$0 sm:$0xff] }
 0x6e0   :  { %v3525_v20 = vadd.f32 %v2718_v3, %v1357_v15  ;;  %v2722_v21 = vadd.f32 %v2633_v18, %v2400_v54  ;;  %v1334_v23 = vpop.f32.mrb[11].mxu1 }
 0x6e1   :  { %v3527_v25 = vadd.f32 %v2720_v16, %v1355_v19  ;;  %v2724_v27 = vadd.f32 %v2400_v54, %v1334_v23 }
 0x6e2   :  { %v3529_v28 = vadd.f32 %v2722_v21, %v1357_v15  ;;  %v1377_v29 = vsel %vm401_vm1, %v3525_v20, -inf  ;;  %v1485_v30 = vmax.f32 %v3525_v20, 0.0 }
 0x6e3   :  { %v1368_v32 = vsel %vm401_vm1, %v3527_v25, -inf  ;;  %v3536_v33 = vadd.f32 %v2724_v27, %v1355_v19  ;;  %v1483_v34 = vmax.f32 %v3527_v25, 0.0 }
 0x6e4   :  { %v1378_v36 = vsel %vm401_vm1, %v3529_v28, -inf  ;;  %v1486_v37 = vmax.f32 %v3529_v28, 0.0  ;;  %v1683_v38 = vpack.c.bf16 %v3529_v28, %v3525_v20  ;;  %v2425_v20 = vld [vmem:[#allocation14 + $0x2] ss:$0 sm:$0xff] }
 0x6e5   :  { %v1379_v40 = vmax.f32 %v1377_v29, %v1378_v36  ;;  %v1369_v41 = vsel %vm401_vm1, %v3536_v33, -inf  ;;  %v1484_v42 = vmax.f32 %v3536_v33, 0.0  ;;  %v1682_v43 = vpack.c.bf16 %v3536_v33, %v3527_v25  ;;  %v2827_v25 = vld [vmem:[%s3704_s9 + $0x38] sm:$0xff]   ;;  %v2828_v33 = vld [vmem:[%s3703_s8 + $0x30] sm:$0xff]  }
 0x6e6   :  { %v1493_v44 = vpack.c.bf16 %v1486_v37, %v1485_v30  ;;  %v1370_v45 = vmax.f32 %v1368_v32, %v1369_v41 }
 0x6e7   :  { %v1380_v46 = vrot.slane %v1379_v40, 4  ;;  %v1492_v47 = vpack.c.bf16 %v1484_v42, %v1483_v34 }
 0x6e8   :  { %v1371_v48 = vrot.slane %v1370_v45, 4 }
 0x6e9   :  { %v1381_v49 = vmax.f32 %v1379_v40, %v1380_v46 }
 0x6ea   :  { %v1372_v24 = vmax.f32 %v1370_v45, %v1371_v48  ;;  %v2826_v48 = vld [vmem:[%s3704_s9 + $0x30] sm:$0xff]  }
 0x6eb   :  { %v1382_v31 = vrot.slane %v1381_v49, 2 }
 0x6ec   :  { %v1373_v22 = vrot.slane %v1372_v24, 2 }
 0x6ed   :  { %v1383_v26 = vmax.f32 %v1381_v49, %v1382_v31 }
 0x6ee   :  { %v1374_v35 = vmax.f32 %v1372_v24, %v1373_v22 }
 0x6ef   :  { %v1384_v39 = vrot.slane %v1383_v26, 1 }
 0x6f0   :  { %v1375_v50 = vrot.slane %v1374_v35, 1 }
 0x6f1   :  { %v1385_v51 = vmax.f32 %v1383_v26, %v1384_v39 }
 0x6f2   :  { %v1376_v52 = vmax.f32 %v1374_v35, %v1375_v50 }
 0x6f3   :  { %v1387_v53 = vmax.f32 %v1385_v51, 0.0 }
 0x6f4   :  { %v1386_v55 = vmax.f32 %v1376_v52, 0.0  ;;  %v1394_v56 = vsel %vm588_vm3, %v1385_v51, %v1376_v52 }
 0x6f6   :  { %v1390_v58 = vsel %vm583_vm4, %v1387_v53, %v1386_v55 }
 0x6f7   :  { %v1396_v60 = vsel %vm591_vm5, %v1390_v58, %v1394_v56 }
 0x6f8   :  { %v1397_v61 = vpack.c.bf16 %v1396_v60, %v1396_v60 }
 0x6fa   :  { %2639 = vmatmul.mubr.msk.bf16.vlgmr.msra.gmra.mrb[20].mxu0 %vm401_vm1, %v1397_v61 }
 0x6fb   :  { %2643 = vmatpush3.bf16.msra.mxu0 %v2820_v63  ;;  %2646 = vmatprep.mubr.msk.bf16.mxu0 %vm401_vm1, %v1492_v47  ;;  %v2825_v47 = vld [vmem:[#allocation16 + $0x28] sm:$0xff]  }
 0x6fc   :  { %2644 = vmatprep.subr.bf16.mxu0 %v2821_v62 }
 0x6ff   :  { %2645 = vmatpush3.bf16.msra.mxu0 %v2821_v62 }
 0x700   :  { %2666 = vmatprep.subr.bf16.mxu0 %v3108_v17 }
 0x702   :  { %2647 = vmatmul.mubr.msk.bf16.vlgmr.msra.gmra.mrb[24].mxu0 %vm401_vm1, %v1493_v44 }
 0x703   :  { %2670 = vmatprep.mubr.msk.bf16.mxu0 %vm3109_vm2, %v3108_v17  ;;  %2667 = vmatpush3.bf16.msra.mxu0 %v2826_v48 }
 0x704   :  { %2668 = vmatprep.subr.bf16.mxu0 %v3108_v17 }
 0x707   :  { %2669 = vmatpush3.bf16.msra.mxu0 %v2827_v25 }
 0x708   :  { %2674 = vmatprep.subr.bf16.mxu0 %v2828_v33 }
 0x7cd   :  { %v1452_v4 = vpop.f32.mrb[20].mxu0 }
 0x7ce   :  { %v1465_v5 = vrot.slane %v1452_v4, %v3427_v6  ;;  %v2640_v7 = vpop.f32.mrb[21].mxu0 }
 0x7cf   :  { %v1455_v9 = vpop.f32.mrb[22].mxu0 }
 0x7d0   :  { %v1466_v10 = vcombine.high %v1465_v5, %v1465_v5  ;;  %v1473_v11 = vrot.slane %v1465_v5, %v3427_v6  ;;  %v2641_v12 = vpop.f32.mrb[23].mxu0 }
 0x7d2   :  { %v1481_v13 = vcombine.high %v1473_v11, %v1473_v11  ;;  %v1480_v57 = vrot.slane %v1466_v10, %v3427_v6  ;;  %v1564_v15 = vrot.slane %v1473_v11, %v3431_v14 }
 0x7d4   :  { %v1568_v63 = vrot.slane %v1480_v57, %v3431_v14  ;;  %v1754_v54 = vrot.slane %v1481_v13, %v3431_v14  ;;  %v1482_v59 = vcombine.high %v1480_v57, %v1480_v57 }
 0x7d5   :  { %v2648_v3 = vpop.f32.mrb[24].mxu0 }
 0x7d6   :  { %v1573_v16 = vadd.f32 %v2648_v3, %v1568_v63  ;;  %1759 = vrot.lane.b32.xlu0 %v1754_v54, %s3111_s28  ;;  %v1546_v18 = vpop.f32.mrb[25].mxu0  ;;  %v1758_v19 = vrot.slane %v1482_v59, %v3431_v14 }
 0x7d7   :  { %v1571_v21 = vadd.f32 %v1564_v15, %v1546_v18  ;;  %v2649_v23 = vpop.f32.mrb[26].mxu0 }
 0x7d8   :  { %v1585_v27 = vadd.f32 %v2420_v8, %v1573_v16  ;;  %v1574_v29 = vadd.f32 %v2649_v23, %v1568_v63  ;;  %1761 = vrot.lane.b32.xlu1 %v1758_v19, %s3111_s28  ;;  %v1549_v30 = vpop.f32.mrb[27].mxu0 }
 0x7d9   :  { %v1583_v32 = vadd.f32 %v2420_v8, %v1571_v21  ;;  %v1572_v34 = vadd.f32 %v1564_v15, %v1549_v30 }
 0x7da   :  { %v1586_v36 = vadd.f32 %v2420_v8, %v1574_v29  ;;  %v1589_v40 = vmax.f32 %v1585_v27, 0.0 }
 0x7db   :  { %v1584_v37 = vadd.f32 %v2420_v8, %v1572_v34  ;;  %v1587_v42 = vmax.f32 %v1583_v32, 0.0  ;;  %v2829_v32 = vld [vmem:[%s3703_s8 + $0x38] sm:$0xff]  }
 0x7dc   :  { %v1590_v41 = vmax.f32 %v1586_v36, 0.0  ;;  %v2830_v34 = vld [vmem:[#allocation13 + $0x30] sm:$0xff]   ;;  %v2831_v36 = vld [vmem:[#allocation13 + $0x38] sm:$0xff]  }
 0x7dd   :  { %v1588_v44 = vmax.f32 %v1584_v37, 0.0  ;;  %v2832_v37 = vld [vmem:[#allocation16 + $0x30] sm:$0xff]  }
 0x7de   :  { %v1597_v45 = vpack.c.bf16 %v1590_v41, %v1589_v40 }
 0x7df   :  { %v1596_v46 = vpack.c.bf16 %v1588_v44, %v1587_v42 }
 0x7e1   :  { %2654 = vmatprep.mubr.msk.bf16.mxu1 %vm401_vm1, %v1596_v46 }
 0x7e2   :  { %2655 = vmatmul.mubr.msk.bf16.vlgmr.msra.gmra.mrb[12].mxu1 %vm401_vm1, %v1597_v45 }
 0x7e3   :  { %2659 = vmatpush3.bf16.msra.mxu1 %v2824_v2  ;;  %2662 = vmatprep.mubr.msk.bf16.mxu1 %vm401_vm1, %v1682_v43 }
 0x7e4   :  { %2660 = vmatprep.subr.bf16.mxu1 %v2825_v47 }
 0x7e7   :  { %2661 = vmatpush3.bf16.msra.mxu1 %v2825_v47 }
 0x7e8   :  { %2682 = vmatprep.subr.bf16.mxu1 %v2830_v34 }
 0x7ee   :  { %2663 = vmatmul.mubr.msk.bf16.vlgmr.msra.gmra.mrb[12].mxu1 %vm401_vm1, %v1683_v38 }
 0x7ef   :  { %2683 = vmatpush3.bf16.msra.mxu1 %v2830_v34 }
 0x7f0   :  { %2684 = vmatprep.subr.bf16.mxu1 %v2831_v36 }
 0x7f3   :  { %2685 = vmatpush3.bf16.msra.mxu1 %v2831_v36 }
 0x7f4   :  { %2690 = vmatprep.subr.bf16.mxu1 %v2832_v37 }
 0x848   :  { %v1760_v22 = vpop.permute.xlu0 %1759 }
 0x84a   :  { %v1762_v49 = vpop.permute.xlu1 %1761 }
 0x8c1   :  { %v2664_v28 = vpop.f32.mrb[12].mxu1 }
 0x8c2   :  { %v2726_v38 = vadd.f32 %v2664_v28, %v2425_v20  ;;  %v1736_v43 = vpop.f32.mrb[13].mxu1 }
 0x8c3   :  { %v2728_v24 = vadd.f32 %v2425_v20, %v1736_v43  ;;  %v2665_v31 = vpop.f32.mrb[14].mxu1  ;;  %v2445_v43 = vld [vmem:[#allocation11 + $0x3] ss:$0 sm:$0xff] }
 0x8c4   :  { %v3590_v26 = vadd.f32 %v2726_v38, %v1762_v49  ;;  %v2730_v35 = vadd.f32 %v2665_v31, %v2425_v20  ;;  %v1739_v39 = vpop.f32.mrb[15].mxu1 }
 0x8c5   :  { %v3592_v50 = vadd.f32 %v2728_v24, %v1760_v22  ;;  %v2732_v51 = vadd.f32 %v2425_v20, %v1739_v39 }
 0x8c6   :  { %v3594_v52 = vadd.f32 %v2730_v35, %v1762_v49  ;;  %v1782_v53 = vsel %vm401_vm1, %v3590_v26, -inf  ;;  %v1890_v55 = vmax.f32 %v3590_v26, 0.0 }
 0x8c7   :  { %v1773_v56 = vsel %vm401_vm1, %v3592_v50, -inf  ;;  %v3601_v58 = vadd.f32 %v2732_v51, %v1760_v22  ;;  %v1888_v60 = vmax.f32 %v3592_v50, 0.0 }
 0x8c8   :  { %v1783_v61 = vsel %vm401_vm1, %v3594_v52, -inf  ;;  %v1891_v62 = vmax.f32 %v3594_v52, 0.0  ;;  %v2088_v0 = vpack.c.bf16 %v3594_v52, %v3590_v26 }
 0x8c9   :  { %v1784_v1 = vmax.f32 %v1782_v53, %v1783_v61  ;;  %v1774_v2 = vsel %vm401_vm1, %v3601_v58, -inf  ;;  %v1889_v4 = vmax.f32 %v3601_v58, 0.0  ;;  %v2087_v5 = vpack.c.bf16 %v3601_v58, %v3592_v50  ;;  %v2835_v50 = vld [vmem:[%s3709_s14 + $0x8] sm:$0xff]   ;;  %v2450_v58 = vld [vmem:[#allocation14 + $0x3] ss:$0 sm:$0xff] }
 0x8ca   :  { %v1898_v7 = vpack.c.bf16 %v1891_v62, %v1890_v55  ;;  %v1775_v9 = vmax.f32 %v1773_v56, %v1774_v2 }
 0x8cb   :  { %v1785_v10 = vrot.slane %v1784_v1, 4  ;;  %v1897_v11 = vpack.c.bf16 %v1889_v4, %v1888_v60 }
 0x8cc   :  { %v1776_v12 = vrot.slane %v1775_v9, 4 }
 0x8cd   :  { %v1786_v13 = vmax.f32 %v1784_v1, %v1785_v10 }
 0x8ce   :  { %v1777_v57 = vmax.f32 %v1775_v9, %v1776_v12 }
 0x8cf   :  { %v1787_v63 = vrot.slane %v1786_v13, 2 }
 0x8d0   :  { %v1778_v54 = vrot.slane %v1777_v57, 2 }
 0x8d1   :  { %v1788_v59 = vmax.f32 %v1786_v13, %v1787_v63 }
 0x8d2   :  { %v1779_v3 = vmax.f32 %v1777_v57, %v1778_v54 }
 0x8d3   :  { %v1789_v8 = vrot.slane %v1788_v59, 1 }
 0x8d4   :  { %v1780_v15 = vrot.slane %v1779_v3, 1 }
 0x8d5   :  { %v1790_v16 = vmax.f32 %v1788_v59, %v1789_v8 }
 0x8d6   :  { %v1781_v18 = vmax.f32 %v1779_v3, %v1780_v15 }
 0x8d7   :  { %v1792_v19 = vmax.f32 %v1790_v16, 0.0 }
 0x8d8   :  { %v1791_v21 = vmax.f32 %v1781_v18, 0.0  ;;  %v1799_v23 = vsel %vm588_vm3, %v1790_v16, %v1781_v18 }
 0x8da   :  { %v1795_v27 = vsel %vm583_vm4, %v1792_v19, %v1791_v21 }
 0x8db   :  { %v1801_v29 = vsel %vm591_vm5, %v1795_v27, %v1799_v23 }
 0x8dc   :  { %v1802_v30 = vpack.c.bf16 %v1801_v29, %v1801_v29 }
 0x8de   :  { %2671 = vmatmul.mubr.msk.bf16.vlgmr.msra.gmra.mrb[28].mxu0 %vm401_vm1, %v1802_v30 }
 0x8df   :  { %2675 = vmatpush3.bf16.msra.mxu0 %v2828_v33  ;;  %2678 = vmatprep.mubr.msk.bf16.mxu0 %vm401_vm1, %v1897_v11  ;;  %v2833_v11 = vld [vmem:[#allocation16 + $0x38] sm:$0xff]  }
 0x8e0   :  { %2676 = vmatprep.subr.bf16.mxu0 %v2829_v32 }
 0x8e3   :  { %2677 = vmatpush3.bf16.msra.mxu0 %v2829_v32 }
 0x8e4   :  { %2698 = vmatprep.subr.bf16.mxu0 %v3108_v17 }
 0x8e6   :  { %2679 = vmatmul.mubr.msk.bf16.vlgmr.msra.gmra.mrb[32].mxu0 %vm401_vm1, %v1898_v7 }
 0x8e7   :  { %2702 = vmatprep.mubr.msk.bf16.mxu0 %vm3109_vm2, %v3108_v17 }
 0x9b1   :  { %v1857_v40 = vpop.f32.mrb[28].mxu0 }
 0x9b2   :  { %v1870_v41 = vrot.slane %v1857_v40, %v3427_v6  ;;  %v2672_v42 = vpop.f32.mrb[29].mxu0 }
 0x9b3   :  { %v1860_v44 = vpop.f32.mrb[30].mxu0 }
 0x9b4   :  { %v1871_v45 = vcombine.high %v1870_v41, %v1870_v41  ;;  %v1878_v46 = vrot.slane %v1870_v41, %v3427_v6  ;;  %v2673_v47 = vpop.f32.mrb[31].mxu0 }
 0x9b6   :  { %v1886_v48 = vcombine.high %v1878_v46, %v1878_v46  ;;  %v1885_v25 = vrot.slane %v1871_v45, %v3427_v6  ;;  %v1969_v49 = vrot.slane %v1878_v46, %v3431_v14 }
 0x9b8   :  { %v1973_v33 = vrot.slane %v1885_v25, %v3431_v14  ;;  %v2159_v20 = vrot.slane %v1886_v48, %v3431_v14  ;;  %v1887_v28 = vcombine.high %v1885_v25, %v1885_v25 }
 0x9b9   :  { %v2680_v38 = vpop.f32.mrb[32].mxu0 }
 0x9ba   :  { %v1978_v24 = vadd.f32 %v2680_v38, %v1973_v33  ;;  %2164 = vrot.lane.b32.xlu0 %v2159_v20, %s3111_s28  ;;  %v1951_v31 = vpop.f32.mrb[33].mxu0  ;;  %v2163_v22 = vrot.slane %v1887_v28, %v3431_v14  ;;  %v2834_v14 = vld [vmem:[%s3709_s14] sm:$0xff]   ;;  %s3112_s14 = smov [#allocation18]  }
 0x9bb   :  { %v1976_v35 = vadd.f32 %v1969_v49, %v1951_v31  ;;  %v2681_v39 = vpop.f32.mrb[34].mxu0  ;;  %2699 = vmatpush3.bf16.msra.mxu0 %v2834_v14  ;;  %s2321_s0 = sshll.u32 %s3112_s14, 4  ;;  %s2322_s0 = int_to_ptr.vmem [resolvable:$true] %s2321_s0 }
 0x9bc   :  { %v1990_v51 = vadd.f32 %v2445_v43, %v1978_v24  ;;  %v1979_v53 = vadd.f32 %v2681_v39, %v1973_v33  ;;  %2166 = vrot.lane.b32.xlu1 %v2163_v22, %s3111_s28  ;;  %v1954_v55 = vpop.f32.mrb[35].mxu0  ;;  %2700 = vmatprep.subr.bf16.mxu0 %v3108_v17  ;;  %s3034_s20 = scalar_lea.vmem %s2322_s0, 512  ;;  %p3039_p3 = scmp.lt.s32.totalorder %s2322_s0, %s2322_s0 }
 0x9bd   :  { %v1988_v56 = vadd.f32 %v2445_v43, %v1976_v35  ;;  %v1977_v60 = vadd.f32 %v1969_v49, %v1954_v55  ;;  %p3035_p2 = scmp.ne.s32.totalorder %s2322_s0, %s3034_s20  ;;  %p3040_p4 = scmp.lt.s32.totalorder %s3034_s20, %s3034_s20 }
 0x9be   :  { %v1991_v61 = vadd.f32 %v2445_v43, %v1979_v53  ;;  %v1994_v1 = vmax.f32 %v1990_v51, 0.0 }
 0x9bf   :  { %v1989_v62 = vadd.f32 %v2445_v43, %v1977_v60  ;;  %v1992_v4 = vmax.f32 %v1988_v56, 0.0  ;;  %2701 = vmatpush3.bf16.msra.mxu0 %v2835_v50  ;;  %p3041_p5 = por %p3040_p4, %p3039_p3 }
 0x9c0   :  { %v1995_v2 = vmax.f32 %v1991_v61, 0.0 }
 0x9c1   :  { %v1993_v7 = vmax.f32 %v1989_v62, 0.0  ;;  %p3042_p6 = pnand %p3041_p5, %p3035_p2 }
 0x9c2   :  { %v2002_v9 = vpack.c.bf16 %v1995_v2, %v1994_v1 }
 0x9c3   :  { %v2001_v10 = vpack.c.bf16 %v1993_v7, %v1992_v4 }
 0x9c5   :  { %2686 = vmatprep.mubr.msk.bf16.mxu1 %vm401_vm1, %v2001_v10 }
 0x9c6   :  { %2687 = vmatmul.mubr.msk.bf16.vlgmr.msra.gmra.mrb[16].mxu1 %vm401_vm1, %v2002_v9 }
 0x9c7   :  { %2691 = vmatpush3.bf16.msra.mxu1 %v2832_v37  ;;  %2694 = vmatprep.mubr.msk.bf16.mxu1 %vm401_vm1, %v2087_v5 }
 0x9c8   :  { %2692 = vmatprep.subr.bf16.mxu1 %v2833_v11 }
 0x9cb   :  { %2693 = vmatpush3.bf16.msra.mxu1 %v2833_v11 }
 0x9d2   :  { %2695 = vmatmul.mubr.msk.bf16.vlgmr.msra.gmra.mrb[16].mxu1 %vm401_vm1, %v2088_v0 }
 0xa2c   :  { %v2165_v0 = vpop.permute.xlu0 %2164 }
 0xa2e   :  { %v2167_v57 = vpop.permute.xlu1 %2166 }
 0xaa5   :  { %v2696_v5 = vpop.f32.mrb[16].mxu1 }
 0xaa6   :  { %v2734_v12 = vadd.f32 %v2696_v5, %v2450_v58  ;;  %v2141_v13 = vpop.f32.mrb[17].mxu1 }
 0xaa7   :  { %v2736_v26 = vadd.f32 %v2450_v58, %v2141_v13  ;;  %v2697_v52 = vpop.f32.mrb[18].mxu1 }
 0xaa8   :  { %v2735_v63 = vadd.f32 %v2734_v12, %v2167_v57  ;;  %v2738_v54 = vadd.f32 %v2697_v52, %v2450_v58  ;;  %v2144_v59 = vpop.f32.mrb[19].mxu1 }
 0xaa9   :  { %v2737_v3 = vadd.f32 %v2736_v26, %v2165_v0  ;;  %v2740_v8 = vadd.f32 %v2450_v58, %v2144_v59 }
 0xaaa   :  { %2180 = vst.msk [vmem:[#allocation18 + $0x10] sm:$0xff] %vm401_vm1, %v2735_v63  ;;  %v2739_v17 = vadd.f32 %v2738_v54, %v2167_v57  ;;  %v2191_v16 = vsel %vm401_vm1, %v2735_v63, -inf }
 0xaab   :  { %2178 = vst.msk [vmem:[#allocation18] sm:$0xff] %vm401_vm1, %v2737_v3  ;;  %v2741_v15 = vadd.f32 %v2740_v8, %v2165_v0  ;;  %v2182_v19 = vsel %vm401_vm1, %v2737_v3, -inf }
 0xaac   :  { %2181 = vst.msk [vmem:[#allocation18 + $0x18] sm:$0xff] %vm401_vm1, %v2739_v17  ;;  %v2192_v18 = vsel %vm401_vm1, %v2739_v17, -inf }
 0xaad   :  { %v2193_v21 = vmax.f32 %v2191_v16, %v2192_v18  ;;  %2179 = vst.msk [vmem:[#allocation18 + $0x8] sm:$0xff] %vm401_vm1, %v2741_v15  ;;  %v2183_v23 = vsel %vm401_vm1, %v2741_v15, -inf }
 0xaae   :  { %v2184_v27 = vmax.f32 %v2182_v19, %v2183_v23 }
 0xaaf   :  { %v2194_v29 = vrot.slane %v2193_v21, 4 }
 0xab0   :  { %v2185_v30 = vrot.slane %v2184_v27, 4 }
 0xab1   :  { %v2195_v32 = vmax.f32 %v2193_v21, %v2194_v29 }
 0xab2   :  { %v2186_v34 = vmax.f32 %v2184_v27, %v2185_v30 }
 0xab3   :  { %v2196_v36 = vrot.slane %v2195_v32, 2 }
 0xab4   :  { %v2187_v37 = vrot.slane %v2186_v34, 2 }
 0xab5   :  { %v2197_v40 = vmax.f32 %v2195_v32, %v2196_v36 }
 0xab6   :  { %v2188_v41 = vmax.f32 %v2186_v34, %v2187_v37 }
 0xab7   :  { %v2198_v42 = vrot.slane %v2197_v40, 1 }
 0xab8   :  { %v2189_v44 = vrot.slane %v2188_v41, 1 }
 0xab9   :  { %v2199_v45 = vmax.f32 %v2197_v40, %v2198_v42 }
 0xaba   :  { %v2190_v46 = vmax.f32 %v2188_v41, %v2189_v44 }
 0xabb   :  { %v2201_v47 = vmax.f32 %v2199_v45, 0.0 }
 0xabc   :  { %v2200_v48 = vmax.f32 %v2190_v46, 0.0 }
 0xabd   :  { %v2203_v25 = vpack.c.bf16 %v2201_v47, %v2201_v47 }
 0xabe   :  { %v2202_v33 = vpack.c.bf16 %v2200_v48, %v2200_v48 }
 0xabf   :  { %v2218_v20 = vunpack.c.l.b16 %v2203_v25 }
 0xac0   :  { %v2217_v28 = vunpack.c.l.b16 %v2202_v33 }
 0xac2   :  { %v2219_v38 = vsel %vm583_vm4, %v2218_v20, %v2217_v28 }
 0xac3   :  { %v2220_v43 = vpack.c.b16 %v2219_v38, %v2219_v38 }
 0xac5   :  { %2703 = vmatmul.mubr.msk.bf16.vlgmr.msra.gmra.mrb[36].mxu0 %vm401_vm1, %v2220_v43 }
 0xac6   :  { %3045 = shalt.err (!%p3042_p6)
}
 0xac7   :  { %s3046_s21 = scalar_lea.hbm %s3712_s17, 512 }
 0xac8   :  { %p3047_p7 = scmp.ne.s32.totalorder %s3712_s17, %s3046_s21  ;;  %p3050_p8 = scmp.lt.u32.totalorder %s3046_s21, %s3712_s17 }
 0xaca   :  { %p3052_p9 = pnand %p3050_p8, %p3047_p7 }
 0xacc   :  { %3055 = shalt.err (!%p3052_p9)
}
 0xacd   :  { %s3113_s1 = smov 128   ;;  %s3114_s2 = smov 8   ;;  %v2455_v49 = vld [vmem:[%s3710_s15] ss:$0 sm:$0xff]  ;;  %vm2301_vm6 = vcmask 253952  }
 0xace   :  { %2327 = dma.vmem_to_hbm [thread:$0]  %s2322_s0, 512, %s3712_s17, [#allocation19], %s3113_s1, %s3113_s1, %s3114_s2  }
 0xacf   :  { %s3115_s7 = smov [#allocation17]  }
 0xad0   :  { %s2309_s30 = sshll.u32 %s3115_s7, 4  ;;  %s2310_s30 = int_to_ptr.vmem [resolvable:$true] %s2309_s30 }
 0xad1   :  { %s3056_s17 = scalar_lea.vmem %s2310_s30, 32  ;;  %p3061_p11 = scmp.lt.s32.totalorder %s2310_s30, %s2310_s30 }
 0xad2   :  { %p3057_p10 = scmp.ne.s32.totalorder %s2310_s30, %s3056_s17  ;;  %p3062_p12 = scmp.lt.s32.totalorder %s3056_s17, %s3056_s17 }
 0xad4   :  { %p3063_p13 = por %p3062_p12, %p3061_p11 }
 0xad6   :  { %p3064_p0 = pnand %p3063_p13, %p3057_p10 }
 0xb98   :  { %v2270_v24 = vpop.f32.mrb[36].mxu0 }
 0xb99   :  { %v2271_v31 = vadd.f32 %v2455_v49, %v2270_v24  ;;  %v2704_v22 = vpop.f32.mrb[37].mxu0 }
 0xb9a   :  { %v2273_v35 = vpop.f32.mrb[38].mxu0 }
 0xb9b   :  { %v2283_v39 = vrot.slane %v2271_v31, %v3427_v6  ;;  %v2705_v51 = vpop.f32.mrb[39].mxu0 }
 0xb9d   :  { %v2284_v53 = vcombine.high %v2283_v39, %v2283_v39  ;;  %v2291_v55 = vrot.slane %v2283_v39, %v3427_v6 }
 0xb9f   :  { %v2298_v56 = vrot.slane %v2284_v53, %v3427_v6  ;;  %2302 = vst.msk [vmem:[#allocation17] sm:$0x1] %vm2301_vm6, %v2291_v55 }
 0xba1   :  { %2303 = vst.msk [vmem:[#allocation17 + $0x1] sm:$0x1] %vm2301_vm6, %v2298_v56 }
 0xba2   :  { %3067 = shalt.err (!%p3064_p0)
}
 0xba3   :  { %s3068_s26 = scalar_lea.hbm %s3711_s16, 32 }
 0xba4   :  { %p3069_p1 = scmp.ne.s32.totalorder %s3711_s16, %s3068_s26  ;;  %p3072_p2 = scmp.lt.u32.totalorder %s3068_s26, %s3711_s16 }
 0xba6   :  { %p3074_p3 = pnand %p3072_p2, %p3069_p1 }
 0xba8   :  { %3077 = shalt.err (!%p3074_p3)
}
 0xba9   :  { %2315 = dma.vmem_to_hbm [thread:$0]  %s2310_s30, 32, %s3711_s16, [#allocation4], %s3097_s5, %s3097_s5, %s3098_s27  }
 0xbaa   :  { %3088 = dma.done.wait [#allocation4], 32  }
 0xbab   :  { %3089 = vsyncadd [#allocation4], 4294967264 }
 0xbac   :  { %3090 = dma.done.wait [#allocation19], 512  }
 0xbad   :  { %3091 = vsyncadd [#allocation19], 4294966784 }
 0xbae   :  { %2334 = vsyncpa [#allocation3], 1 }
 0xbaf   :  { %2335 = vsyncpa [#allocation6], 1 }
 0xbb0   :  { %2336 = vsyncpa [#allocation9], 1 }
 0xbb1   :  { %2337 = vsyncpa [#allocation12], 1 }
 0xbb2   :  { %2338 = vsyncpa [#allocation15], 1 }
 0xbb3   :  { %2339 = vsyncpa [#allocation4], 1 }
 0xbb4   :  { %2340 = vsyncpa [#allocation19], 1 }

</bundles_post_ra>
